<compile_context>
chip_gen: v6e
topology: v6e:2x2x1
jax: 0.10.0
libtpu: 0.0.40
codegen_flags: <defaults>
</compile_context>

<pallas_src>
import jax
import jax.numpy as jnp
from jax import lax
from jax.experimental import pallas as pl
from jax.experimental.pallas import tpu as pltpu


# ---------------------------------------------------------------------------
# One-time prep (hoisted out of the jitted per-call path)
# ---------------------------------------------------------------------------
def _upsample_weights(n_in, n_out):
    """(n_out, n_in) bilinear interpolation matrix, align_corners=True."""
    if n_out == 1:
        src = jnp.zeros((1,), jnp.float32)
    else:
        src = jnp.arange(n_out, dtype=jnp.float32) * (n_in - 1) / (n_out - 1)
    i0 = jnp.floor(src).astype(jnp.int32)
    i1 = jnp.minimum(i0 + 1, n_in - 1)
    f = src - i0.astype(jnp.float32)
    return (jax.nn.one_hot(i0, n_in, dtype=jnp.float32) * (1.0 - f)[:, None]
            + jax.nn.one_hot(i1, n_in, dtype=jnp.float32) * f[:, None])


def _row_upsample_pad_matrix(h, H_out, ypad):
    """(H_out+2, h): bilinear x2 row-upsample + F.pad(top) + conv zero-pad rows."""
    U = _upsample_weights(h, 2 * h)
    top = ypad // 2
    R = jnp.zeros((H_out + 2, h), jnp.float32)
    return R.at[1 + top:1 + top + 2 * h, :].set(U)


def _col_upsample_pad_matrix(w, W_out, xpad, C):
    """(w*C, (W_out+2)*C): bilinear x2 col-upsample + F.pad(left) + conv zero-pad,
    applied identically to each of the C channels (channel-last lane layout)."""
    U = _upsample_weights(w, 2 * w)                       # (2w, w)
    left = xpad // 2
    Up = jnp.zeros((W_out + 2, w), jnp.float32)
    Up = Up.at[1 + left:1 + left + 2 * w, :].set(U)       # (W_out+2, w)
    eye = jnp.eye(C, dtype=jnp.float32)
    return (Up.T[:, None, :, None] * eye[None, :, None, :]
            ).reshape(w * C, (W_out + 2) * C)


def _band_matrices(w, W, in_w_padded, out_w_pad):
    """Turn a 3x3 conv (on a (H, W*C) layout) into 3 banded matmuls, one per ky.

    M[ky][wi*Cin+ci, wo*Cout+co] = w[ky, kx, ci, co]
      with kx = wi-wo   (input already W-zero-padded, width W+2), or
           kx = wi-wo+1 (unpadded input width W; the zero-pad is absorbed),
      zero outside 0 <= kx < 3.
    If out_w_pad, one zero Cout-block is appended on each side so the result is
    already W-padded for the next conv.
    """
    KH, KW, Cin, Cout = w.shape
    Wi = W + 2 if in_w_padded else W
    wi = jnp.arange(Wi)[:, None]
    wo = jnp.arange(W)[None, :]
    kx = wi - wo if in_w_padded else wi - wo + 1
    valid = (kx >= 0) & (kx < KW)
    kxc = jnp.clip(kx, 0, KW - 1)
    mats = []
    for ky in range(KH):
        blk = jnp.where(valid[:, :, None, None], w[ky][kxc], 0.0)  # (Wi, W, Cin, Cout)
        m = blk.transpose(0, 2, 1, 3).reshape(Wi * Cin, W * Cout)
        if out_w_pad:
            m = jnp.pad(m, ((0, 0), (Cout, Cout)))
        mats.append(m)
    return jnp.stack(mats, axis=0)


def prepare_upblock(params, x1_hw, x2_hw):
    """Build prepacked (device) arrays ONCE per weight set: BN folded into conv
    weights, static bilinear/band matrices, lane-tiled bias/alpha; matmul
    operands cast to bf16, elementwise constants kept f32."""
    h, w = x1_hw
    H, W = x2_hw
    w1, w2 = params["w1"], params["w2"]
    C1 = w1.shape[2] // 2
    Cmid, Cout = w1.shape[3], w2.shape[3]
    assert w2.shape[2] == Cmid
    ypad, xpad = H - 2 * h, W - 2 * w
    # TODO(synk): negative pads (cropping) not supported; fail loudly instead of
    # silently building wrong interpolation matrices.
    assert ypad >= 0 and xpad >= 0, (ypad, xpad)

    # Fold eval-mode BN scale into the conv weights (bias applied in-kernel).
    w1f = w1 * params["s1"][None, None, None, :]
    w2f = w2 * params["s2"][None, None, None, :]

    mid_lanes = (W + 2) * Cmid
    mid_pad = ((mid_lanes + 127) // 128) * 128            # lane-align mid activation
    extra = mid_pad - mid_lanes

    # torch.cat([x2, x1], dim=1): x2 channels come first -> split conv1 weights.
    m1a = _band_matrices(w1f[:, :, :C1, :], W, in_w_padded=False, out_w_pad=True)
    m1b = _band_matrices(w1f[:, :, C1:, :], W, in_w_padded=True, out_w_pad=True)
    m2 = _band_matrices(w2f, W, in_w_padded=True, out_w_pad=False)
    m1a = jnp.pad(m1a, ((0, 0), (0, 0), (0, extra)))      # extra zero out-lanes
    m1b = jnp.pad(m1b, ((0, 0), (0, 0), (0, extra)))
    m2 = jnp.pad(m2, ((0, 0), (0, extra), (0, 0)))        # matching zero in-rows

    r1 = _row_upsample_pad_matrix(h, H, ypad)             # (H+2, h)
    cm = _col_upsample_pad_matrix(w, W, xpad, C1)         # (w*C1, (W+2)*C1)

    # Bias / PReLU slope tiled to the lane layout; zeros in all pad columns keep
    # the mid activation's padding exactly zero. Kept f32 (v5e: no bf16 VPU).
    b1t = jnp.pad(jnp.tile(params["b1"], W), (Cmid, Cmid + extra)).reshape(1, -1)
    a1t = jnp.pad(jnp.tile(params["a1"], W), (Cmid, Cmid + extra)).reshape(1, -1)
    b2t = jnp.tile(params["b2"], W).reshape(1, -1)
    a2t = jnp.tile(params["a2"], W).reshape(1, -1)

    bf16 = jnp.bfloat16
    return dict(r1=r1.astype(bf16), cm=cm.astype(bf16),
                m1a=m1a.astype(bf16), m1b=m1b.astype(bf16), m2=m2.astype(bf16),
                b1t=b1t, a1t=a1t, b2t=b2t, a2t=a2t)


# ---------------------------------------------------------------------------
# Fused Pallas kernel: upsample + pad + concat-split conv1 + BN + PReLU
#                      + conv2 + BN + PReLU   (B images per grid step)
# ---------------------------------------------------------------------------
def _upblock_kernel(x1_ref, x2_ref, r1_ref, cm_ref,
                    m1a_ref, m1b_ref, m2_ref,
                    b1_ref, a1_ref, b2_ref, a2_ref, o_ref,
                    x2pad_ref, y1pad_ref):
    B, H = o_ref.shape[0], o_ref.shape[1]
    f32, bf16 = jnp.float32, jnp.bfloat16

    # Pre-zero the row-pad scratches (border rows must be zero; rows 1..H are
    # overwritten below for every image).  Tiny full-tile stores, no MXU cost.
    x2pad_ref[...] = jnp.zeros_like(x2pad_ref)
    y1pad_ref[...] = jnp.zeros_like(y1pad_ref)

    for b in range(B):                                   # static unroll over images
        # x1 branch: bilinear x2 upsample (align_corners=True) + F.pad + conv
        # zero-pad — two small bf16 MXU matmuls with static matrices.
        x1_b = x1_ref[b]                                                  # (h, w*C1)
        rows = jnp.dot(r1_ref[...], x1_b, preferred_element_type=f32)     # (H+2, w*C1)
        x1p = jnp.dot(rows.astype(bf16), cm_ref[...],
                      preferred_element_type=f32).astype(bf16)            # (H+2,(W+2)*C1)

        # x2 skip: conv zero-pad rows via a plain store into pre-zeroed scratch
        # (uses the vst slot instead of an MXU identity matmul).
        x2pad_ref[pl.ds(1, H), :] = x2_ref[b]                             # (H, W*C1)

        # conv1 over the channel-concat [x2, x1up]: two banded bf16 matmuls per
        # kernel row, f32 accumulation; the concat is never materialized.
        acc1 = (jnp.dot(x2pad_ref[pl.ds(0, H), :], m1a_ref[0],
                        preferred_element_type=f32)
                + jnp.dot(x1p[0:H, :], m1b_ref[0], preferred_element_type=f32))
        for ky in range(1, 3):
            acc1 = acc1 + jnp.dot(x2pad_ref[pl.ds(ky, H), :], m1a_ref[ky],
                                  preferred_element_type=f32)
            acc1 = acc1 + jnp.dot(x1p[ky:ky + H, :], m1b_ref[ky],
                                  preferred_element_type=f32)
        y1 = acc1 + b1_ref[...]
        y1 = jnp.where(y1 >= 0.0, y1, a1_ref[...] * y1)                   # PReLU (f32)

        # conv2: mid activation is already W-padded (pad columns stay exactly
        # zero); add the H zero-pad rows via the pre-zeroed scratch, then 3
        # banded matmuls + folded BN + PReLU.
        y1pad_ref[pl.ds(1, H), :] = y1.astype(bf16)
        acc2 = jnp.dot(y1pad_ref[pl.ds(0, H), :], m2_ref[0],
                       preferred_element_type=f32)
        for ky in range(1, 3):
            acc2 = acc2 + jnp.dot(y1pad_ref[pl.ds(ky, H), :], m2_ref[ky],
                                  preferred_element_type=f32)
        y2 = acc2 + b2_ref[...]
        y2 = jnp.where(y2 >= 0.0, y2, a2_ref[...] * y2)                   # PReLU (f32)
        o_ref[b] = y2.astype(o_ref.dtype)                                 # lane-dense


def upblock_forward(packed, x1, x2, *, images_per_step=1):
    """UpBlock.forward(x1, x2) with NHWC activations, one fused pallas_call.

    `packed` comes from prepare_upblock (built once per weight set)."""
    N, h, w, C1 = x1.shape
    Nb, H, W, C1b = x2.shape
    assert N == Nb and C1 == C1b
    B = images_per_step
    assert N % B == 0, (N, B)
    mid_pad = packed["m1a"].shape[2]
    Cout = packed["m2"].shape[2] // W

    # Lane-dense 2-D-per-image layout (N, H, W*C); bf16 MXU operands.
    x1_2d = x1.astype(jnp.bfloat16).reshape(N, h, w * C1)
    x2_2d = x2.astype(jnp.bfloat16).reshape(N, H, W * C1)

    def full_spec(a):  # whole-array block, constant index_map (no re-DMA per step)
        nd = a.ndim
        return pl.BlockSpec(a.shape, lambda g, _nd=nd: (0,) * _nd)

    weights = (packed["r1"], packed["cm"], packed["m1a"], packed["m1b"],
               packed["m2"], packed["b1t"], packed["a1t"], packed["b2t"],
               packed["a2t"])

    out2d = pl.pallas_call(
        _upblock_kernel,
        out_shape=jax.ShapeDtypeStruct((N, H, W * Cout), jnp.float32),
        grid_spec=pltpu.PrefetchScalarGridSpec(
            num_scalar_prefetch=0,
            grid=(N // B,),
            in_specs=[
                pl.BlockSpec((B, h, w * C1), lambda g: (g, 0, 0)),
                pl.BlockSpec((B, H, W * C1), lambda g: (g, 0, 0)),
            ] + [full_spec(a) for a in weights],
            out_specs=pl.BlockSpec((B, H, W * Cout), lambda g: (g, 0, 0)),
            scratch_shapes=[
                pltpu.VMEM((H + 2, W * C1), jnp.bfloat16),   # x2 row-pad scratch
                pltpu.VMEM((H + 2, mid_pad), jnp.bfloat16),  # mid row-pad scratch
            ]),
        compiler_params=pltpu.CompilerParams(
            dimension_semantics=("parallel",)),
    )(x1_2d, x2_2d, *weights)
    return out2d.reshape(N, H, W, Cout)


# ---------------------------------------------------------------------------
# Pure-JAX reference (same math as the PyTorch module, NHWC) for validation
# ---------------------------------------------------------------------------
def _bilinear_up2_ref(x):
    N, Hi, Wi, C = x.shape
    Ho, Wo = 2 * Hi, 2 * Wi

    def coords(n_out, n_in):
        if n_out == 1:
            return jnp.zeros((1,), jnp.float32)
        return jnp.arange(n_out, dtype=jnp.float32) * (n_in - 1) / (n_out - 1)

    ys, xs = coords(Ho, Hi), coords(Wo, Wi)
    y0 = jnp.floor(ys).astype(jnp.int32)
    y1 = jnp.minimum(y0 + 1, Hi - 1)
    wy = (ys - y0.astype(jnp.float32))[None, :, None, None]
    x0 = jnp.floor(xs).astype(jnp.int32)
    x1 = jnp.minimum(x0 + 1, Wi - 1)
    wx = (xs - x0.astype(jnp.float32))[None, None, :, None]
    rows = x[:, y0] * (1.0 - wy) + x[:, y1] * wy
    return rows[:, :, x0] * (1.0 - wx) + rows[:, :, x1] * wx


def _upblock_reference(params, x1, x2):
    x1u = _bilinear_up2_ref(x1)
    ypad = x2.shape[1] - x1u.shape[1]
    xpad = x2.shape[2] - x1u.shape[2]
    x1u = jnp.pad(x1u, ((0, 0), (ypad // 2, ypad - ypad // 2),
                        (xpad // 2, xpad - xpad // 2), (0, 0)))
    x = jnp.concatenate([x2, x1u], axis=-1)

    def conv_bn_prelu(x, wgt, s, b, a):
        y = lax.conv_general_dilated(x, wgt, (1, 1), ((1, 1), (1, 1)),
                                     dimension_numbers=("NHWC", "HWIO", "NHWC"))
        y = y * s + b
        return jnp.where(y >= 0, y, a * y)

    y = conv_bn_prelu(x, params["w1"], params["s1"], params["b1"], params["a1"])
    return conv_bn_prelu(y, params["w2"], params["s2"], params["b2"], params["a2"])


# ---------------------------------------------------------------------------
# Deterministic synthetic parameters (conv bias + eval-mode BN folded);
# PReLU is per-channel, matching nn.PReLU(num_parameters=ch) in DoubleConv.
# ---------------------------------------------------------------------------
def make_params(key, in_ch, out_ch):
    mid_ch = in_ch // 2
    eps = 1e-5
    ks = jax.random.split(key, 14)

    def conv_block(keys, cin, cout):
        kw, kb, kg, kbeta, km, kv, ka = keys
        w = jax.random.normal(kw, (3, 3, cin, cout), jnp.float32) * 0.1
        conv_b = jax.random.normal(kb, (cout,), jnp.float32) * 0.05
        gamma = 1.0 + 0.1 * jax.random.normal(kg, (cout,), jnp.float32)
        beta = 0.05 * jax.random.normal(kbeta, (cout,), jnp.float32)
        r_mean = 0.05 * jax.random.normal(km, (cout,), jnp.float32)
        r_var = 1.0 + 0.1 * jax.random.uniform(kv, (cout,), jnp.float32)
        alpha = 0.25 + 0.05 * jax.random.normal(ka, (cout,), jnp.float32)
        scale = gamma / jnp.sqrt(r_var + eps)
        bias = (conv_b - r_mean) * scale + beta
        return w, scale, bias, alpha

    w1, s1, b1, a1 = conv_block(ks[0:7], in_ch, mid_ch)
    w2, s2, b2, a2 = conv_block(ks[7:14], mid_ch, out_ch)
    return dict(w1=w1, s1=s1, b1=b1, a1=a1, w2=w2, s2=s2, b2=b2, a2=a2)


if __name__ == "__main__":
    key = jax.random.PRNGKey(0)
    k1, k2, kp = jax.random.split(key, 3)

    in_ch, out_ch = 8, 8          # UpBlock(in_ch=8, out_ch=8, bilinear=True)
    N, H, W = 4, 16, 16           # x2 spatial size; x1 is (H/2, W/2)
    c_half = in_ch // 2

    # NCHW reference shapes: x1 = (4, 4, 8, 8), x2 = (4, 4, 16, 16); NHWC here.
    x1 = jax.random.normal(k1, (N, H // 2, W // 2, c_half), jnp.float32)
    x2 = jax.random.normal(k2, (N, H, W, c_half), jnp.float32)
    params = make_params(kp, in_ch, out_ch)

    # One-time prep (hoisted out of the jitted per-call path).
    packed = prepare_upblock(params, (H // 2, W // 2), (H, W))

    fwd = jax.jit(upblock_forward, static_argnames=("images_per_step",))
    out = fwd(packed, x1, x2, images_per_step=2)   # grid=(2,), 2 images/step
    out = jax.block_until_ready(out)
    assert out.shape == (N, H, W, out_ch), out.shape
    assert bool(jnp.all(jnp.isfinite(out)))

    ref = jax.jit(_upblock_reference)(params, x1, x2)
    # Tolerance covers bf16 MXU operands (f32 accumulation) vs the f32 reference.
    max_err = float(jnp.max(jnp.abs(out - ref)))
    assert max_err < 1e-1, max_err
    print("KERNEL_OK")
</pallas_src>

<mosaic_0001>
module attributes {stable_mosaic.version = 11 : i64} {
  func.func @_upblock_kernel(%arg0: i32, %arg1: memref<2x8x32xbf16, #tpu.memory_space<vmem>>, %arg2: memref<2x16x64xbf16, #tpu.memory_space<vmem>>, %arg3: memref<18x8xbf16, #tpu.memory_space<vmem>>, %arg4: memref<32x72xbf16, #tpu.memory_space<vmem>>, %arg5: memref<3x64x128xbf16, #tpu.memory_space<vmem>>, %arg6: memref<3x72x128xbf16, #tpu.memory_space<vmem>>, %arg7: memref<3x128x128xbf16, #tpu.memory_space<vmem>>, %arg8: memref<1x128xf32, #tpu.memory_space<vmem>>, %arg9: memref<1x128xf32, #tpu.memory_space<vmem>>, %arg10: memref<1x128xf32, #tpu.memory_space<vmem>>, %arg11: memref<1x128xf32, #tpu.memory_space<vmem>>, %arg12: memref<2x16x128xf32, #tpu.memory_space<vmem>>, %arg13: memref<18x64xbf16, #tpu.memory_space<vmem>>, %arg14: memref<18x128xbf16, #tpu.memory_space<vmem>>) attributes {dimension_semantics = [#tpu.dimension_semantics<parallel>], iteration_bounds = array<i64: 2>, scalar_prefetch = 0 : i64, scratch_operands = 2 : i64, tpu.core_type = #tpu.core_type<tc>, window_params = [{transform_indices = @transform_0, window_bounds = array<i64: 2, 8, 32>}, {transform_indices = @transform_1, window_bounds = array<i64: 2, 16, 64>}, {pipeline_mode = #tpu.pipeline_mode<synchronous>, transform_indices = @transform_2, window_bounds = array<i64: 18, 8>}, {pipeline_mode = #tpu.pipeline_mode<synchronous>, transform_indices = @transform_3, window_bounds = array<i64: 32, 72>}, {pipeline_mode = #tpu.pipeline_mode<synchronous>, transform_indices = @transform_4, window_bounds = array<i64: 3, 64, 128>}, {pipeline_mode = #tpu.pipeline_mode<synchronous>, transform_indices = @transform_5, window_bounds = array<i64: 3, 72, 128>}, {pipeline_mode = #tpu.pipeline_mode<synchronous>, transform_indices = @transform_6, window_bounds = array<i64: 3, 128, 128>}, {pipeline_mode = #tpu.pipeline_mode<synchronous>, transform_indices = @transform_7, window_bounds = array<i64: 1, 128>}, {pipeline_mode = #tpu.pipeline_mode<synchronous>, transform_indices = @transform_8, window_bounds = array<i64: 1, 128>}, {pipeline_mode = #tpu.pipeline_mode<synchronous>, transform_indices = @transform_9, window_bounds = array<i64: 1, 128>}, {pipeline_mode = #tpu.pipeline_mode<synchronous>, transform_indices = @transform_10, window_bounds = array<i64: 1, 128>}, {transform_indices = @transform_11, window_bounds = array<i64: 2, 16, 128>}]} {
    %cst = arith.constant 0.000000e+00 : bf16
    %0 = vector.broadcast %cst : bf16 to vector<18x64xbf16>
    %c0 = arith.constant 0 : index
    %c0_0 = arith.constant 0 : index
    %1 = vector.load %arg13[%c0, %c0_0] : memref<18x64xbf16, #tpu.memory_space<vmem>>, vector<18x64xbf16>
    tpu.vector_store %arg13[%c0, %c0_0], %0 {strides = array<i32>} : memref<18x64xbf16, #tpu.memory_space<vmem>>, vector<18x64xbf16>,
    %cst_1 = arith.constant 0.000000e+00 : bf16
    %2 = vector.broadcast %cst_1 : bf16 to vector<18x128xbf16>
    %c0_2 = arith.constant 0 : index
    %c0_3 = arith.constant 0 : index
    %3 = vector.load %arg14[%c0_2, %c0_3] : memref<18x128xbf16, #tpu.memory_space<vmem>>, vector<18x128xbf16>
    tpu.vector_store %arg14[%c0_2, %c0_3], %2 {strides = array<i32>} : memref<18x128xbf16, #tpu.memory_space<vmem>>, vector<18x128xbf16>,
    %c0_4 = arith.constant 0 : index
    %c0_5 = arith.constant 0 : index
    %c0_6 = arith.constant 0 : index
    %4 = vector.load %arg1[%c0_4, %c0_5, %c0_6] : memref<2x8x32xbf16, #tpu.memory_space<vmem>>, vector<1x8x32xbf16>
    %5 = vector.shape_cast %4 : vector<1x8x32xbf16> to vector<8x32xbf16>
    %c0_7 = arith.constant 0 : index
    %c0_8 = arith.constant 0 : index
    %6 = vector.load %arg3[%c0_7, %c0_8] : memref<18x8xbf16, #tpu.memory_space<vmem>>, vector<18x8xbf16>
    %cst_9 = arith.constant dense<0.000000e+00> : vector<18x32xf32>
    %7 = tpu.matmul %6, %5, %cst_9 {dimension_numbers = #tpu.dot_dimension_numbers<[1], [0], [0], [1], [0, 0, 1, 1], [], []>} : vector<18x8xbf16>, vector<8x32xbf16>, vector<18x32xf32> -> vector<18x32xf32>
    %8 = arith.truncf %7 : vector<18x32xf32> to vector<18x32xbf16>
    %c0_10 = arith.constant 0 : index
    %c0_11 = arith.constant 0 : index
    %9 = vector.load %arg4[%c0_10, %c0_11] : memref<32x72xbf16, #tpu.memory_space<vmem>>, vector<32x72xbf16>
    %cst_12 = arith.constant dense<0.000000e+00> : vector<18x72xf32>
    %10 = tpu.matmul %8, %9, %cst_12 {dimension_numbers = #tpu.dot_dimension_numbers<[1], [0], [0], [1], [0, 0, 1, 1], [], []>} : vector<18x32xbf16>, vector<32x72xbf16>, vector<18x72xf32> -> vector<18x72xf32>
    %11 = arith.truncf %10 : vector<18x72xf32> to vector<18x72xbf16>
    %c0_13 = arith.constant 0 : index
    %c0_14 = arith.constant 0 : index
    %c0_15 = arith.constant 0 : index
    %12 = vector.load %arg2[%c0_13, %c0_14, %c0_15] : memref<2x16x64xbf16, #tpu.memory_space<vmem>>, vector<1x16x64xbf16>
    %13 = vector.shape_cast %12 : vector<1x16x64xbf16> to vector<16x64xbf16>
    %c1 = arith.constant 1 : index
    %c0_16 = arith.constant 0 : index
    %14 = vector.load %arg13[%c1, %c0_16] : memref<18x64xbf16, #tpu.memory_space<vmem>>, vector<16x64xbf16>
    tpu.vector_store %arg13[%c1, %c0_16], %13 {strides = array<i32>} : memref<18x64xbf16, #tpu.memory_space<vmem>>, vector<16x64xbf16>,
    %c0_17 = arith.constant 0 : index
    %c0_18 = arith.constant 0 : index
    %15 = vector.load %arg13[%c0_17, %c0_18] : memref<18x64xbf16, #tpu.memory_space<vmem>>, vector<16x64xbf16>
    %c0_19 = arith.constant 0 : index
    %c0_20 = arith.constant 0 : index
    %c0_21 = arith.constant 0 : index
    %16 = vector.load %arg5[%c0_19, %c0_20, %c0_21] : memref<3x64x128xbf16, #tpu.memory_space<vmem>>, vector<1x64x128xbf16>
    %17 = vector.shape_cast %16 : vector<1x64x128xbf16> to vector<64x128xbf16>
    %cst_22 = arith.constant dense<0.000000e+00> : vector<16x128xf32>
    %18 = tpu.matmul %15, %17, %cst_22 {dimension_numbers = #tpu.dot_dimension_numbers<[1], [0], [0], [1], [0, 0, 1, 1], [], []>} : vector<16x64xbf16>, vector<64x128xbf16>, vector<16x128xf32> -> vector<16x128xf32>
    %19 = vector.extract_strided_slice %11 {offsets = [0, 0], sizes = [16, 72], strides = [1, 1]} : vector<18x72xbf16> to vector<16x72xbf16>
    %c0_23 = arith.constant 0 : index
    %c0_24 = arith.constant 0 : index
    %c0_25 = arith.constant 0 : index
    %20 = vector.load %arg6[%c0_23, %c0_24, %c0_25] : memref<3x72x128xbf16, #tpu.memory_space<vmem>>, vector<1x72x128xbf16>
    %21 = vector.shape_cast %20 : vector<1x72x128xbf16> to vector<72x128xbf16>
    %cst_26 = arith.constant dense<0.000000e+00> : vector<16x128xf32>
    %22 = tpu.matmul %19, %21, %cst_26 {dimension_numbers = #tpu.dot_dimension_numbers<[1], [0], [0], [1], [0, 0, 1, 1], [], []>} : vector<16x72xbf16>, vector<72x128xbf16>, vector<16x128xf32> -> vector<16x128xf32>
    %23 = arith.addf %18, %22 : vector<16x128xf32>
    %c1_27 = arith.constant 1 : index
    %c0_28 = arith.constant 0 : index
    %24 = vector.load %arg13[%c1_27, %c0_28] : memref<18x64xbf16, #tpu.memory_space<vmem>>, vector<16x64xbf16>
    %c1_29 = arith.constant 1 : index
    %c0_30 = arith.constant 0 : index
    %c0_31 = arith.constant 0 : index
    %25 = vector.load %arg5[%c1_29, %c0_30, %c0_31] : memref<3x64x128xbf16, #tpu.memory_space<vmem>>, vector<1x64x128xbf16>
    %26 = vector.shape_cast %25 : vector<1x64x128xbf16> to vector<64x128xbf16>
    %cst_32 = arith.constant dense<0.000000e+00> : vector<16x128xf32>
    %27 = tpu.matmul %24, %26, %cst_32 {dimension_numbers = #tpu.dot_dimension_numbers<[1], [0], [0], [1], [0, 0, 1, 1], [], []>} : vector<16x64xbf16>, vector<64x128xbf16>, vector<16x128xf32> -> vector<16x128xf32>
    %28 = arith.addf %23, %27 : vector<16x128xf32>
    %29 = vector.extract_strided_slice %11 {offsets = [1, 0], sizes = [16, 72], strides = [1, 1]} : vector<18x72xbf16> to vector<16x72xbf16>
    %c1_33 = arith.constant 1 : index
    %c0_34 = arith.constant 0 : index
    %c0_35 = arith.constant 0 : index
    %30 = vector.load %arg6[%c1_33, %c0_34, %c0_35] : memref<3x72x128xbf16, #tpu.memory_space<vmem>>, vector<1x72x128xbf16>
    %31 = vector.shape_cast %30 : vector<1x72x128xbf16> to vector<72x128xbf16>
    %cst_36 = arith.constant dense<0.000000e+00> : vector<16x128xf32>
    %32 = tpu.matmul %29, %31, %cst_36 {dimension_numbers = #tpu.dot_dimension_numbers<[1], [0], [0], [1], [0, 0, 1, 1], [], []>} : vector<16x72xbf16>, vector<72x128xbf16>, vector<16x128xf32> -> vector<16x128xf32>
    %33 = arith.addf %28, %32 : vector<16x128xf32>
    %c2 = arith.constant 2 : index
    %c0_37 = arith.constant 0 : index
    %34 = vector.load %arg13[%c2, %c0_37] : memref<18x64xbf16, #tpu.memory_space<vmem>>, vector<16x64xbf16>
    %c2_38 = arith.constant 2 : index
    %c0_39 = arith.constant 0 : index
    %c0_40 = arith.constant 0 : index
    %35 = vector.load %arg5[%c2_38, %c0_39, %c0_40] : memref<3x64x128xbf16, #tpu.memory_space<vmem>>, vector<1x64x128xbf16>
    %36 = vector.shape_cast %35 : vector<1x64x128xbf16> to vector<64x128xbf16>
    %cst_41 = arith.constant dense<0.000000e+00> : vector<16x128xf32>
    %37 = tpu.matmul %34, %36, %cst_41 {dimension_numbers = #tpu.dot_dimension_numbers<[1], [0], [0], [1], [0, 0, 1, 1], [], []>} : vector<16x64xbf16>, vector<64x128xbf16>, vector<16x128xf32> -> vector<16x128xf32>
    %38 = arith.addf %33, %37 : vector<16x128xf32>
    %39 = vector.extract_strided_slice %11 {offsets = [2, 0], sizes = [16, 72], strides = [1, 1]} : vector<18x72xbf16> to vector<16x72xbf16>
    %c2_42 = arith.constant 2 : index
    %c0_43 = arith.constant 0 : index
    %c0_44 = arith.constant 0 : index
    %40 = vector.load %arg6[%c2_42, %c0_43, %c0_44] : memref<3x72x128xbf16, #tpu.memory_space<vmem>>, vector<1x72x128xbf16>
    %41 = vector.shape_cast %40 : vector<1x72x128xbf16> to vector<72x128xbf16>
    %cst_45 = arith.constant dense<0.000000e+00> : vector<16x128xf32>
    %42 = tpu.matmul %39, %41, %cst_45 {dimension_numbers = #tpu.dot_dimension_numbers<[1], [0], [0], [1], [0, 0, 1, 1], [], []>} : vector<16x72xbf16>, vector<72x128xbf16>, vector<16x128xf32> -> vector<16x128xf32>
    %43 = arith.addf %38, %42 : vector<16x128xf32>
    %c0_46 = arith.constant 0 : index
    %c0_47 = arith.constant 0 : index
    %44 = vector.load %arg8[%c0_46, %c0_47] : memref<1x128xf32, #tpu.memory_space<vmem>>, vector<1x128xf32>
    %45 = vector.broadcast %44 : vector<1x128xf32> to vector<16x128xf32>
    %46 = arith.addf %43, %45 : vector<16x128xf32>
    %cst_48 = arith.constant 0.000000e+00 : f32
    %47 = vector.broadcast %cst_48 : f32 to vector<16x128xf32>
    %48 = arith.cmpf oge, %46, %47 : vector<16x128xf32>
    %c0_49 = arith.constant 0 : index
    %c0_50 = arith.constant 0 : index
    %49 = vector.load %arg9[%c0_49, %c0_50] : memref<1x128xf32, #tpu.memory_space<vmem>>, vector<1x128xf32>
    %50 = vector.broadcast %49 : vector<1x128xf32> to vector<16x128xf32>
    %51 = arith.mulf %50, %46 : vector<16x128xf32>
    %52 = arith.select %48, %46, %51 : vector<16x128xi1>, vector<16x128xf32>
    %53 = arith.truncf %52 : vector<16x128xf32> to vector<16x128xbf16>
    %c1_51 = arith.constant 1 : index
    %c0_52 = arith.constant 0 : index
    %54 = vector.load %arg14[%c1_51, %c0_52] : memref<18x128xbf16, #tpu.memory_space<vmem>>, vector<16x128xbf16>
    tpu.vector_store %arg14[%c1_51, %c0_52], %53 {strides = array<i32>} : memref<18x128xbf16, #tpu.memory_space<vmem>>, vector<16x128xbf16>,
    %c0_53 = arith.constant 0 : index
    %c0_54 = arith.constant 0 : index
    %55 = vector.load %arg14[%c0_53, %c0_54] : memref<18x128xbf16, #tpu.memory_space<vmem>>, vector<16x128xbf16>
    %c0_55 = arith.constant 0 : index
    %c0_56 = arith.constant 0 : index
    %c0_57 = arith.constant 0 : index
    %56 = vector.load %arg7[%c0_55, %c0_56, %c0_57] : memref<3x128x128xbf16, #tpu.memory_space<vmem>>, vector<1x128x128xbf16>
    %57 = vector.shape_cast %56 : vector<1x128x128xbf16> to vector<128x128xbf16>
    %cst_58 = arith.constant dense<0.000000e+00> : vector<16x128xf32>
    %58 = tpu.matmul %55, %57, %cst_58 {dimension_numbers = #tpu.dot_dimension_numbers<[1], [0], [0], [1], [0, 0, 1, 1], [], []>} : vector<16x128xbf16>, vector<128x128xbf16>, vector<16x128xf32> -> vector<16x128xf32>
    %c1_59 = arith.constant 1 : index
    %c0_60 = arith.constant 0 : index
    %59 = vector.load %arg14[%c1_59, %c0_60] : memref<18x128xbf16, #tpu.memory_space<vmem>>, vector<16x128xbf16>
    %c1_61 = arith.constant 1 : index
    %c0_62 = arith.constant 0 : index
    %c0_63 = arith.constant 0 : index
    %60 = vector.load %arg7[%c1_61, %c0_62, %c0_63] : memref<3x128x128xbf16, #tpu.memory_space<vmem>>, vector<1x128x128xbf16>
    %61 = vector.shape_cast %60 : vector<1x128x128xbf16> to vector<128x128xbf16>
    %cst_64 = arith.constant dense<0.000000e+00> : vector<16x128xf32>
    %62 = tpu.matmul %59, %61, %cst_64 {dimension_numbers = #tpu.dot_dimension_numbers<[1], [0], [0], [1], [0, 0, 1, 1], [], []>} : vector<16x128xbf16>, vector<128x128xbf16>, vector<16x128xf32> -> vector<16x128xf32>
    %63 = arith.addf %58, %62 : vector<16x128xf32>
    %c2_65 = arith.constant 2 : index
    %c0_66 = arith.constant 0 : index
    %64 = vector.load %arg14[%c2_65, %c0_66] : memref<18x128xbf16, #tpu.memory_space<vmem>>, vector<16x128xbf16>
    %c2_67 = arith.constant 2 : index
    %c0_68 = arith.constant 0 : index
    %c0_69 = arith.constant 0 : index
    %65 = vector.load %arg7[%c2_67, %c0_68, %c0_69] : memref<3x128x128xbf16, #tpu.memory_space<vmem>>, vector<1x128x128xbf16>
    %66 = vector.shape_cast %65 : vector<1x128x128xbf16> to vector<128x128xbf16>
    %cst_70 = arith.constant dense<0.000000e+00> : vector<16x128xf32>
    %67 = tpu.matmul %64, %66, %cst_70 {dimension_numbers = #tpu.dot_dimension_numbers<[1], [0], [0], [1], [0, 0, 1, 1], [], []>} : vector<16x128xbf16>, vector<128x128xbf16>, vector<16x128xf32> -> vector<16x128xf32>
    %68 = arith.addf %63, %67 : vector<16x128xf32>
    %c0_71 = arith.constant 0 : index
    %c0_72 = arith.constant 0 : index
    %69 = vector.load %arg10[%c0_71, %c0_72] : memref<1x128xf32, #tpu.memory_space<vmem>>, vector<1x128xf32>
    %70 = vector.broadcast %69 : vector<1x128xf32> to vector<16x128xf32>
    %71 = arith.addf %68, %70 : vector<16x128xf32>
    %cst_73 = arith.constant 0.000000e+00 : f32
    %72 = vector.broadcast %cst_73 : f32 to vector<16x128xf32>
    %73 = arith.cmpf oge, %71, %72 : vector<16x128xf32>
    %c0_74 = arith.constant 0 : index
    %c0_75 = arith.constant 0 : index
    %74 = vector.load %arg11[%c0_74, %c0_75] : memref<1x128xf32, #tpu.memory_space<vmem>>, vector<1x128xf32>
    %75 = vector.broadcast %74 : vector<1x128xf32> to vector<16x128xf32>
    %76 = arith.mulf %75, %71 : vector<16x128xf32>
    %77 = arith.select %73, %71, %76 : vector<16x128xi1>, vector<16x128xf32>
    %c0_76 = arith.constant 0 : index
    %c0_77 = arith.constant 0 : index
    %c0_78 = arith.constant 0 : index
    %78 = vector.load %arg12[%c0_76, %c0_77, %c0_78] : memref<2x16x128xf32, #tpu.memory_space<vmem>>, vector<1x16x128xf32>
    %79 = vector.shape_cast %78 : vector<1x16x128xf32> to vector<16x128xf32>
    %80 = vector.shape_cast %77 : vector<16x128xf32> to vector<1x16x128xf32>
    tpu.vector_store %arg12[%c0_76, %c0_77, %c0_78], %80 {strides = array<i32>} : memref<2x16x128xf32, #tpu.memory_space<vmem>>, vector<1x16x128xf32>,
    %c1_79 = arith.constant 1 : index
    %c0_80 = arith.constant 0 : index
    %c0_81 = arith.constant 0 : index
    %81 = vector.load %arg1[%c1_79, %c0_80, %c0_81] : memref<2x8x32xbf16, #tpu.memory_space<vmem>>, vector<1x8x32xbf16>
    %82 = vector.shape_cast %81 : vector<1x8x32xbf16> to vector<8x32xbf16>
    %c0_82 = arith.constant 0 : index
    %c0_83 = arith.constant 0 : index
    %83 = vector.load %arg3[%c0_82, %c0_83] : memref<18x8xbf16, #tpu.memory_space<vmem>>, vector<18x8xbf16>
    %cst_84 = arith.constant dense<0.000000e+00> : vector<18x32xf32>
    %84 = tpu.matmul %83, %82, %cst_84 {dimension_numbers = #tpu.dot_dimension_numbers<[1], [0], [0], [1], [0, 0, 1, 1], [], []>} : vector<18x8xbf16>, vector<8x32xbf16>, vector<18x32xf32> -> vector<18x32xf32>
    %85 = arith.truncf %84 : vector<18x32xf32> to vector<18x32xbf16>
    %c0_85 = arith.constant 0 : index
    %c0_86 = arith.constant 0 : index
    %86 = vector.load %arg4[%c0_85, %c0_86] : memref<32x72xbf16, #tpu.memory_space<vmem>>, vector<32x72xbf16>
    %cst_87 = arith.constant dense<0.000000e+00> : vector<18x72xf32>
    %87 = tpu.matmul %85, %86, %cst_87 {dimension_numbers = #tpu.dot_dimension_numbers<[1], [0], [0], [1], [0, 0, 1, 1], [], []>} : vector<18x32xbf16>, vector<32x72xbf16>, vector<18x72xf32> -> vector<18x72xf32>
    %88 = arith.truncf %87 : vector<18x72xf32> to vector<18x72xbf16>
    %c1_88 = arith.constant 1 : index
    %c0_89 = arith.constant 0 : index
    %c0_90 = arith.constant 0 : index
    %89 = vector.load %arg2[%c1_88, %c0_89, %c0_90] : memref<2x16x64xbf16, #tpu.memory_space<vmem>>, vector<1x16x64xbf16>
    %90 = vector.shape_cast %89 : vector<1x16x64xbf16> to vector<16x64xbf16>
    %c1_91 = arith.constant 1 : index
    %c0_92 = arith.constant 0 : index
    %91 = vector.load %arg13[%c1_91, %c0_92] : memref<18x64xbf16, #tpu.memory_space<vmem>>, vector<16x64xbf16>
    tpu.vector_store %arg13[%c1_91, %c0_92], %90 {strides = array<i32>} : memref<18x64xbf16, #tpu.memory_space<vmem>>, vector<16x64xbf16>,
    %c0_93 = arith.constant 0 : index
    %c0_94 = arith.constant 0 : index
    %92 = vector.load %arg13[%c0_93, %c0_94] : memref<18x64xbf16, #tpu.memory_space<vmem>>, vector<16x64xbf16>
    %c0_95 = arith.constant 0 : index
    %c0_96 = arith.constant 0 : index
    %c0_97 = arith.constant 0 : index
    %93 = vector.load %arg5[%c0_95, %c0_96, %c0_97] : memref<3x64x128xbf16, #tpu.memory_space<vmem>>, vector<1x64x128xbf16>
    %94 = vector.shape_cast %93 : vector<1x64x128xbf16> to vector<64x128xbf16>
    %cst_98 = arith.constant dense<0.000000e+00> : vector<16x128xf32>
    %95 = tpu.matmul %92, %94, %cst_98 {dimension_numbers = #tpu.dot_dimension_numbers<[1], [0], [0], [1], [0, 0, 1, 1], [], []>} : vector<16x64xbf16>, vector<64x128xbf16>, vector<16x128xf32> -> vector<16x128xf32>
    %96 = vector.extract_strided_slice %88 {offsets = [0, 0], sizes = [16, 72], strides = [1, 1]} : vector<18x72xbf16> to vector<16x72xbf16>
    %c0_99 = arith.constant 0 : index
    %c0_100 = arith.constant 0 : index
    %c0_101 = arith.constant 0 : index
    %97 = vector.load %arg6[%c0_99, %c0_100, %c0_101] : memref<3x72x128xbf16, #tpu.memory_space<vmem>>, vector<1x72x128xbf16>
    %98 = vector.shape_cast %97 : vector<1x72x128xbf16> to vector<72x128xbf16>
    %cst_102 = arith.constant dense<0.000000e+00> : vector<16x128xf32>
    %99 = tpu.matmul %96, %98, %cst_102 {dimension_numbers = #tpu.dot_dimension_numbers<[1], [0], [0], [1], [0, 0, 1, 1], [], []>} : vector<16x72xbf16>, vector<72x128xbf16>, vector<16x128xf32> -> vector<16x128xf32>
    %100 = arith.addf %95, %99 : vector<16x128xf32>
    %c1_103 = arith.constant 1 : index
    %c0_104 = arith.constant 0 : index
    %101 = vector.load %arg13[%c1_103, %c0_104] : memref<18x64xbf16, #tpu.memory_space<vmem>>, vector<16x64xbf16>
    %c1_105 = arith.constant 1 : index
    %c0_106 = arith.constant 0 : index
    %c0_107 = arith.constant 0 : index
    %102 = vector.load %arg5[%c1_105, %c0_106, %c0_107] : memref<3x64x128xbf16, #tpu.memory_space<vmem>>, vector<1x64x128xbf16>
    %103 = vector.shape_cast %102 : vector<1x64x128xbf16> to vector<64x128xbf16>
    %cst_108 = arith.constant dense<0.000000e+00> : vector<16x128xf32>
    %104 = tpu.matmul %101, %103, %cst_108 {dimension_numbers = #tpu.dot_dimension_numbers<[1], [0], [0], [1], [0, 0, 1, 1], [], []>} : vector<16x64xbf16>, vector<64x128xbf16>, vector<16x128xf32> -> vector<16x128xf32>
    %105 = arith.addf %100, %104 : vector<16x128xf32>
    %106 = vector.extract_strided_slice %88 {offsets = [1, 0], sizes = [16, 72], strides = [1, 1]} : vector<18x72xbf16> to vector<16x72xbf16>
    %c1_109 = arith.constant 1 : index
    %c0_110 = arith.constant 0 : index
    %c0_111 = arith.constant 0 : index
    %107 = vector.load %arg6[%c1_109, %c0_110, %c0_111] : memref<3x72x128xbf16, #tpu.memory_space<vmem>>, vector<1x72x128xbf16>
    %108 = vector.shape_cast %107 : vector<1x72x128xbf16> to vector<72x128xbf16>
    %cst_112 = arith.constant dense<0.000000e+00> : vector<16x128xf32>
    %109 = tpu.matmul %106, %108, %cst_112 {dimension_numbers = #tpu.dot_dimension_numbers<[1], [0], [0], [1], [0, 0, 1, 1], [], []>} : vector<16x72xbf16>, vector<72x128xbf16>, vector<16x128xf32> -> vector<16x128xf32>
    %110 = arith.addf %105, %109 : vector<16x128xf32>
    %c2_113 = arith.constant 2 : index
    %c0_114 = arith.constant 0 : index
    %111 = vector.load %arg13[%c2_113, %c0_114] : memref<18x64xbf16, #tpu.memory_space<vmem>>, vector<16x64xbf16>
    %c2_115 = arith.constant 2 : index
    %c0_116 = arith.constant 0 : index
    %c0_117 = arith.constant 0 : index
    %112 = vector.load %arg5[%c2_115, %c0_116, %c0_117] : memref<3x64x128xbf16, #tpu.memory_space<vmem>>, vector<1x64x128xbf16>
    %113 = vector.shape_cast %112 : vector<1x64x128xbf16> to vector<64x128xbf16>
    %cst_118 = arith.constant dense<0.000000e+00> : vector<16x128xf32>
    %114 = tpu.matmul %111, %113, %cst_118 {dimension_numbers = #tpu.dot_dimension_numbers<[1], [0], [0], [1], [0, 0, 1, 1], [], []>} : vector<16x64xbf16>, vector<64x128xbf16>, vector<16x128xf32> -> vector<16x128xf32>
    %115 = arith.addf %110, %114 : vector<16x128xf32>
    %116 = vector.extract_strided_slice %88 {offsets = [2, 0], sizes = [16, 72], strides = [1, 1]} : vector<18x72xbf16> to vector<16x72xbf16>
    %c2_119 = arith.constant 2 : index
    %c0_120 = arith.constant 0 : index
    %c0_121 = arith.constant 0 : index
    %117 = vector.load %arg6[%c2_119, %c0_120, %c0_121] : memref<3x72x128xbf16, #tpu.memory_space<vmem>>, vector<1x72x128xbf16>
    %118 = vector.shape_cast %117 : vector<1x72x128xbf16> to vector<72x128xbf16>
    %cst_122 = arith.constant dense<0.000000e+00> : vector<16x128xf32>
    %119 = tpu.matmul %116, %118, %cst_122 {dimension_numbers = #tpu.dot_dimension_numbers<[1], [0], [0], [1], [0, 0, 1, 1], [], []>} : vector<16x72xbf16>, vector<72x128xbf16>, vector<16x128xf32> -> vector<16x128xf32>
    %120 = arith.addf %115, %119 : vector<16x128xf32>
    %c0_123 = arith.constant 0 : index
    %c0_124 = arith.constant 0 : index
    %121 = vector.load %arg8[%c0_123, %c0_124] : memref<1x128xf32, #tpu.memory_space<vmem>>, vector<1x128xf32>
    %122 = vector.broadcast %121 : vector<1x128xf32> to vector<16x128xf32>
    %123 = arith.addf %120, %122 : vector<16x128xf32>
    %cst_125 = arith.constant 0.000000e+00 : f32
    %124 = vector.broadcast %cst_125 : f32 to vector<16x128xf32>
    %125 = arith.cmpf oge, %123, %124 : vector<16x128xf32>
    %c0_126 = arith.constant 0 : index
    %c0_127 = arith.constant 0 : index
    %126 = vector.load %arg9[%c0_126, %c0_127] : memref<1x128xf32, #tpu.memory_space<vmem>>, vector<1x128xf32>
    %127 = vector.broadcast %126 : vector<1x128xf32> to vector<16x128xf32>
    %128 = arith.mulf %127, %123 : vector<16x128xf32>
    %129 = arith.select %125, %123, %128 : vector<16x128xi1>, vector<16x128xf32>
    %130 = arith.truncf %129 : vector<16x128xf32> to vector<16x128xbf16>
    %c1_128 = arith.constant 1 : index
    %c0_129 = arith.constant 0 : index
    %131 = vector.load %arg14[%c1_128, %c0_129] : memref<18x128xbf16, #tpu.memory_space<vmem>>, vector<16x128xbf16>
    tpu.vector_store %arg14[%c1_128, %c0_129], %130 {strides = array<i32>} : memref<18x128xbf16, #tpu.memory_space<vmem>>, vector<16x128xbf16>,
    %c0_130 = arith.constant 0 : index
    %c0_131 = arith.constant 0 : index
    %132 = vector.load %arg14[%c0_130, %c0_131] : memref<18x128xbf16, #tpu.memory_space<vmem>>, vector<16x128xbf16>
    %c0_132 = arith.constant 0 : index
    %c0_133 = arith.constant 0 : index
    %c0_134 = arith.constant 0 : index
    %133 = vector.load %arg7[%c0_132, %c0_133, %c0_134] : memref<3x128x128xbf16, #tpu.memory_space<vmem>>, vector<1x128x128xbf16>
    %134 = vector.shape_cast %133 : vector<1x128x128xbf16> to vector<128x128xbf16>
    %cst_135 = arith.constant dense<0.000000e+00> : vector<16x128xf32>
    %135 = tpu.matmul %132, %134, %cst_135 {dimension_numbers = #tpu.dot_dimension_numbers<[1], [0], [0], [1], [0, 0, 1, 1], [], []>} : vector<16x128xbf16>, vector<128x128xbf16>, vector<16x128xf32> -> vector<16x128xf32>
    %c1_136 = arith.constant 1 : index
    %c0_137 = arith.constant 0 : index
    %136 = vector.load %arg14[%c1_136, %c0_137] : memref<18x128xbf16, #tpu.memory_space<vmem>>, vector<16x128xbf16>
    %c1_138 = arith.constant 1 : index
    %c0_139 = arith.constant 0 : index
    %c0_140 = arith.constant 0 : index
    %137 = vector.load %arg7[%c1_138, %c0_139, %c0_140] : memref<3x128x128xbf16, #tpu.memory_space<vmem>>, vector<1x128x128xbf16>
    %138 = vector.shape_cast %137 : vector<1x128x128xbf16> to vector<128x128xbf16>
    %cst_141 = arith.constant dense<0.000000e+00> : vector<16x128xf32>
    %139 = tpu.matmul %136, %138, %cst_141 {dimension_numbers = #tpu.dot_dimension_numbers<[1], [0], [0], [1], [0, 0, 1, 1], [], []>} : vector<16x128xbf16>, vector<128x128xbf16>, vector<16x128xf32> -> vector<16x128xf32>
    %140 = arith.addf %135, %139 : vector<16x128xf32>
    %c2_142 = arith.constant 2 : index
    %c0_143 = arith.constant 0 : index
    %141 = vector.load %arg14[%c2_142, %c0_143] : memref<18x128xbf16, #tpu.memory_space<vmem>>, vector<16x128xbf16>
    %c2_144 = arith.constant 2 : index
    %c0_145 = arith.constant 0 : index
    %c0_146 = arith.constant 0 : index
    %142 = vector.load %arg7[%c2_144, %c0_145, %c0_146] : memref<3x128x128xbf16, #tpu.memory_space<vmem>>, vector<1x128x128xbf16>
    %143 = vector.shape_cast %142 : vector<1x128x128xbf16> to vector<128x128xbf16>
    %cst_147 = arith.constant dense<0.000000e+00> : vector<16x128xf32>
    %144 = tpu.matmul %141, %143, %cst_147 {dimension_numbers = #tpu.dot_dimension_numbers<[1], [0], [0], [1], [0, 0, 1, 1], [], []>} : vector<16x128xbf16>, vector<128x128xbf16>, vector<16x128xf32> -> vector<16x128xf32>
    %145 = arith.addf %140, %144 : vector<16x128xf32>
    %c0_148 = arith.constant 0 : index
    %c0_149 = arith.constant 0 : index
    %146 = vector.load %arg10[%c0_148, %c0_149] : memref<1x128xf32, #tpu.memory_space<vmem>>, vector<1x128xf32>
    %147 = vector.broadcast %146 : vector<1x128xf32> to vector<16x128xf32>
    %148 = arith.addf %145, %147 : vector<16x128xf32>
    %cst_150 = arith.constant 0.000000e+00 : f32
    %149 = vector.broadcast %cst_150 : f32 to vector<16x128xf32>
    %150 = arith.cmpf oge, %148, %149 : vector<16x128xf32>
    %c0_151 = arith.constant 0 : index
    %c0_152 = arith.constant 0 : index
    %151 = vector.load %arg11[%c0_151, %c0_152] : memref<1x128xf32, #tpu.memory_space<vmem>>, vector<1x128xf32>
    %152 = vector.broadcast %151 : vector<1x128xf32> to vector<16x128xf32>
    %153 = arith.mulf %152, %148 : vector<16x128xf32>
    %154 = arith.select %150, %148, %153 : vector<16x128xi1>, vector<16x128xf32>
    %c1_153 = arith.constant 1 : index
    %c0_154 = arith.constant 0 : index
    %c0_155 = arith.constant 0 : index
    %155 = vector.load %arg12[%c1_153, %c0_154, %c0_155] : memref<2x16x128xf32, #tpu.memory_space<vmem>>, vector<1x16x128xf32>
    %156 = vector.shape_cast %155 : vector<1x16x128xf32> to vector<16x128xf32>
    %157 = vector.shape_cast %154 : vector<16x128xf32> to vector<1x16x128xf32>
    tpu.vector_store %arg12[%c1_153, %c0_154, %c0_155], %157 {strides = array<i32>} : memref<2x16x128xf32, #tpu.memory_space<vmem>>, vector<1x16x128xf32>,
    return
  }
  func.func @transform_0(%arg0: i32) -> (i32, i32, i32) {
    %c0_i32 = arith.constant 0 : i32
    %c0_i32_0 = arith.constant 0 : i32
    %c0_i32_1 = arith.constant 0 : i32
    return %arg0, %c0_i32, %c0_i32_0 : i32, i32, i32
  }
  func.func @transform_1(%arg0: i32) -> (i32, i32, i32) {
    %c0_i32 = arith.constant 0 : i32
    %c0_i32_0 = arith.constant 0 : i32
    %c0_i32_1 = arith.constant 0 : i32
    return %arg0, %c0_i32, %c0_i32_0 : i32, i32, i32
  }
  func.func @transform_2(%arg0: i32) -> (i32, i32) {
    %c0_i32 = arith.constant 0 : i32
    %c0_i32_0 = arith.constant 0 : i32
    %c0_i32_1 = arith.constant 0 : i32
    return %c0_i32, %c0_i32_0 : i32, i32
  }
  func.func @transform_3(%arg0: i32) -> (i32, i32) {
    %c0_i32 = arith.constant 0 : i32
    %c0_i32_0 = arith.constant 0 : i32
    %c0_i32_1 = arith.constant 0 : i32
    return %c0_i32, %c0_i32_0 : i32, i32
  }
  func.func @transform_4(%arg0: i32) -> (i32, i32, i32) {
    %c0_i32 = arith.constant 0 : i32
    %c0_i32_0 = arith.constant 0 : i32
    %c0_i32_1 = arith.constant 0 : i32
    %c0_i32_2 = arith.constant 0 : i32
    return %c0_i32, %c0_i32_0, %c0_i32_1 : i32, i32, i32
  }
  func.func @transform_5(%arg0: i32) -> (i32, i32, i32) {
    %c0_i32 = arith.constant 0 : i32
    %c0_i32_0 = arith.constant 0 : i32
    %c0_i32_1 = arith.constant 0 : i32
    %c0_i32_2 = arith.constant 0 : i32
    return %c0_i32, %c0_i32_0, %c0_i32_1 : i32, i32, i32
  }
  func.func @transform_6(%arg0: i32) -> (i32, i32, i32) {
    %c0_i32 = arith.constant 0 : i32
    %c0_i32_0 = arith.constant 0 : i32
    %c0_i32_1 = arith.constant 0 : i32
    %c0_i32_2 = arith.constant 0 : i32
    return %c0_i32, %c0_i32_0, %c0_i32_1 : i32, i32, i32
  }
  func.func @transform_7(%arg0: i32) -> (i32, i32) {
    %c0_i32 = arith.constant 0 : i32
    %c0_i32_0 = arith.constant 0 : i32
    %c0_i32_1 = arith.constant 0 : i32
    return %c0_i32, %c0_i32_0 : i32, i32
  }
  func.func @transform_8(%arg0: i32) -> (i32, i32) {
    %c0_i32 = arith.constant 0 : i32
    %c0_i32_0 = arith.constant 0 : i32
    %c0_i32_1 = arith.constant 0 : i32
    return %c0_i32, %c0_i32_0 : i32, i32
  }
  func.func @transform_9(%arg0: i32) -> (i32, i32) {
    %c0_i32 = arith.constant 0 : i32
    %c0_i32_0 = arith.constant 0 : i32
    %c0_i32_1 = arith.constant 0 : i32
    return %c0_i32, %c0_i32_0 : i32, i32
  }
  func.func @transform_10(%arg0: i32) -> (i32, i32) {
    %c0_i32 = arith.constant 0 : i32
    %c0_i32_0 = arith.constant 0 : i32
    %c0_i32_1 = arith.constant 0 : i32
    return %c0_i32, %c0_i32_0 : i32, i32
  }
  func.func @transform_11(%arg0: i32) -> (i32, i32, i32) {
    %c0_i32 = arith.constant 0 : i32
    %c0_i32_0 = arith.constant 0 : i32
    %c0_i32_1 = arith.constant 0 : i32
    return %arg0, %c0_i32, %c0_i32_0 : i32, i32, i32
  }
}

</mosaic_0001>

<bundles_post_ra>
// kernel: upblock_forward.1
= control target key start
LH: loop header
LB: loop body
LE: loop exit
PB: predicated region body
PF: predicated region fallthrough
CT: control target
= control target key end

     0   :  { %s3760_s17 = smov 0   ;;  %s4451_s0 = inlined_call_operand.vmem [shape: bf16[4,8,32], index: 0, kind: input, shape index: {}]   ;;  %s4452_s1 = inlined_call_operand.vmem [shape: bf16[4,16,64], index: 1, kind: input, shape index: {}]   ;;  %s4453_s2 = inlined_call_operand.vmem [shape: bf16[18,8], index: 2, kind: input, shape index: {}]   ;;  %s4454_s3 = inlined_call_operand.vmem [shape: bf16[32,72], index: 3, kind: input, shape index: {}]   ;;  %s4455_s4 = inlined_call_operand.vmem [shape: bf16[3,64,128], index: 4, kind: input, shape index: {}]   ;;  %s4456_s5 = inlined_call_operand.vmem [shape: bf16[3,72,128], index: 5, kind: input, shape index: {}]   ;;  %s4457_s6 = inlined_call_operand.vmem [shape: bf16[3,128,128], index: 6, kind: input, shape index: {}]   ;;  %s4458_s7 = inlined_call_operand.vmem [shape: f32[1,128], index: 7, kind: input, shape index: {}]   ;;  %s4459_s8 = inlined_call_operand.vmem [shape: f32[1,128], index: 8, kind: input, shape index: {}]   ;;  %s4460_s9 = inlined_call_operand.vmem [shape: f32[1,128], index: 9, kind: input, shape index: {}]   ;;  %s4461_s10 = inlined_call_operand.vmem [shape: f32[1,128], index: 10, kind: input, shape index: {}]   ;;  %s4462_s11 = inlined_call_operand.vmem [shape: f32[4,16,128], index: 11, kind: output, shape index: {}]  }
   0x1 LB: > { %s2802_s18 = sadd.s32 4294967295, %s3695_s17   ;;  %p2806_p0 = scmp.ge.s32.totalorder %s3695_s17, 1  ;;  %s3695_s17 = sphi %s3760_s17, %s21_s17  }
   0x2   : > { %p350_p1 = scmp.lt.s32.totalorder %s3695_s17, 3 }
   0x4   : > { %p351_p2 = pnand %p2806_p0, %p350_p1 }
   0x5   : > { %s2807_s19 = sshll.u32 (!%p351_p2), %s2802_s18, 1 }
   0x6   : > { %354 = sbr.rel (%p351_p2) target bundleno = 1593 (0x639), region = 64  ;;  %p398_p3 = scmp.lt.s32.totalorder (!%p351_p2), %s2807_s19, 3 }
   0xb   : > { %vm421_vm0 = vcmask 516096   ;;  %v3697_v0 = vmov 0   ;;  %v3567_v1 = vld [vmem:[%s4453_s2] sm:$0xff]   ;;  %vm438_vm1 = vcmask 64512   ;;  %s4474_s19 = smov (!%p398_p3, %s2807_s19), 3  ;;  %vm445_vm2 = vcmask 1043456  }
   0xc   : > { %422 = vst.msk [vmem:[#allocation2 + $0x8] sm:$0x1] %vm421_vm0, %v3697_v0  ;;  %423 = vst [vmem:[#allocation3] sm:$0xf] %v3697_v0  ;;  %3252 = vmatprep.mubr.msk.bf16.mxu0 %vm438_vm1, %v3567_v1  ;;  %s2808_s22 = sshll.u32 %s4474_s19, 2  ;;  %s3110_s23 = sshll.u32 %s4474_s19, 3 }
   0xd   : > { %424 = vst [vmem:[#allocation3 + $0x4] sm:$0xf] %v3697_v0  ;;  %425 = vst [vmem:[#allocation3 + $0x8] sm:$0x1] %v3697_v0  ;;  %s3784_s26 = scalar_lea.vmem %s4451_s0, %s2808_s22  ;;  %s408_s29 = scalar_lea.vmem %s4452_s1, %s3110_s23  ;;  %vm574_vm3 = vsmask.f32 256 }
   0xe   : > { %v426_v2 = vld [vmem:[%s3784_s26] sm:$0xf]  ;;  %v573_v4 = vld [vmem:[%s408_s29 + $0x4] sm:$0xf]  ;;  %vm575_vm4 = vsmask.f32 4368  ;;  %vm3797_vm5 = vmand %vm421_vm0, %vm574_vm3 }
   0xf   : > { %v572_v3 = vld [vmem:[%s408_s29] sm:$0xf]  ;;  %3554 = vmatprep.subr.msk.bf16.mxu0 %vm445_vm2, %v426_v2  ;;  %v3568_v6 = vld [vmem:[%s4453_s2 + $0x8] ss:$0 sps:$4 sm:$0x11]   ;;  %v586_v7 = vshrl.u32 %v573_v4, 16  ;;  %vm3802_vm6 = vmor %vm574_vm3, %vm575_vm4 }
  0x10   : > { %v578_v5 = vshrl.u32 %v572_v3, 16  ;;  %v589_v8 = vshll.u32 %v573_v4, 16  ;;  %v2968_v9 = vld [vmem:[%s408_s29 + $0x8] sm:$0xf]  ;;  %v2969_v11 = vld [vmem:[%s408_s29 + $0xc] sm:$0xf] }
  0x11   : > { %v1738_v12 = vshrl.u32 %v2968_v9, 16  ;;  %v1741_v13 = vshll.u32 %v2968_v9, 16  ;;  %v447_v14 = vsel %vm445_vm2, %v426_v2, 0  ;;  %v588_v15 = vrot.slane %v586_v7, 7  ;;  %v3569_v31 = vld [vmem:[%s4454_s3 + $0x8] sm:$0xff]   ;;  %v3570_v32 = vld [vmem:[%s4454_s3] sm:$0xff]  }
  0x12   : > { %v580_v10 = vrot.slane %v578_v5, 7  ;;  %v1746_v18 = vshrl.u32 %v2969_v11, 16  ;;  %3251 = vmatpush3.bf16.msra.mxu0 %v447_v14  ;;  %v3571_v33 = vld [vmem:[%s4455_s4 + $0x18] sm:$0xff]   ;;  %v3698_v34 = vmov 0.0   ;;  %v3572_v35 = vld [vmem:[%s4455_s4 + $0x10] sm:$0xff]   ;;  %v3573_v36 = vld [vmem:[%s4455_s4 + $0x8] sm:$0xff]  }
  0x13   : > { %v606_v17 = vld [vmem:[#allocation2 + $0x8] sm:$0x1]  ;;  %v1740_v21 = vrot.slane %v1738_v12, 7  ;;  %v591_v22 = vor.u32 %v589_v8, %v588_v15  ;;  %v593_v23 = vrot.slane %v588_v15, 4  ;;  %3256 = vmatprep.subr.bf16.mxu0 %v3569_v31  ;;  %3278 = vmatprep.subr.bf16.mxu1 %v3698_v34  ;;  %vm3699_vm7 = vmmov 0   ;;  %v3575_v38 = vld [vmem:[%s4455_s4] sm:$0xff]  }
  0x14   : > { %v584_v20 = vrot.slane %v580_v10, 4  ;;  %v1748_v24 = vrot.slane %v1746_v18, 7  ;;  %3279 = vmatpush3.bf16.msra.mxu1 %v3571_v33  ;;  %3286 = vmatprep.mubr.msk.bf16.mxu1 %vm3699_vm7, %v3698_v34  ;;  %vm418_vm8 = vcmask 519168   ;;  %v581_v37 = vshll.u32 %v572_v3, 16  ;;  %v3578_v46 = vld [vmem:[%s4456_s5 + $0x44] ss:$0 sps:$4 sm:$0xff]  }
  0x15   : > { %v3806_v25 = vor.u32 %v1741_v13, %v1740_v21  ;;  %3253 = vmatmul.mubr.msk.bf16.vlgmr.msra.gmra.mxu0 %vm438_vm1, %v3568_v6  ;;  %v607_v27 = vsel %vm3797_vm5, %v593_v23, %v606_v17  ;;  %3280 = vmatprep.subr.bf16.mxu1 %v3698_v34  ;;  %419 = vst.msk [vmem:[#allocation2] sm:$0xf] %vm418_vm8, %v3697_v0  ;;  %420 = vst.msk [vmem:[#allocation2 + $0x4] sm:$0xf] %vm418_vm8, %v3697_v0  ;;  %vm598_vm9 = vsmask.f32 7938 }
  0x16   : > { %v592_v26 = vsel %vm3802_vm6, %v584_v20, %v591_v22  ;;  %v1753_v28 = vrot.slane %v1748_v24, 4  ;;  %608 = vst [vmem:[#allocation2 + $0x8] sm:$0x1] %v607_v27  ;;  %3257 = vmatpush3.bf16.msra.mxu0 %v3569_v31  ;;  %v583_v39 = vor.u32 %v581_v37, %v580_v10  ;;  %vm3849_vm10 = vmand %vm418_vm8, %vm598_vm9  ;;  %v1749_v41 = vshll.u32 %v2969_v11, 16  ;;  %v3574_v56 = vld [vmem:[%s4456_s5 + $0x20] ss:$0 sps:$4 sm:$0xff]  }
  0x17   : > { %3258 = vmatprep.subr.bf16.mxu0 %v3570_v32  ;;  %603 = vst.msk [vmem:[#allocation2 + $0x4] sm:$0xf] %vm418_vm8, %v592_v26  ;;  %v1744_v44 = vrot.slane %v1740_v21, 4  ;;  %vm732_vm11 = vcmask 523264   ;;  %v932_v51 = vsel %vm445_vm2, %v3578_v46, 0  ;;  %vm515_vm12 = vcmask 261120  }
  0x18   : > { %3281 = vmatpush3.bf16.msra.mxu1 %v3572_v35  ;;  %v1751_v45 = vor.u32 %v1749_v41, %v1748_v24  ;;  %v660_v60 = vsel %vm445_vm2, %v3574_v56, 0  ;;  %v3576_v61 = vld [vmem:[%s4456_s5 + $0x18] sm:$0xff]   ;;  %v3579_v62 = vld [vmem:[%s4456_s5 + $0x10] sm:$0xff]   ;;  %v3581_v0 = vld [vmem:[%s4456_s5 + $0x8] sm:$0xff]   ;;  %vm797_vm13 = vsmask.f32 7424 }
  0x19   : > { %3282 = vmatprep.subr.bf16.mxu1 %v3698_v34  ;;  %v3580_v63 = vld [vmem:[%s4456_s5 + $0x3c] sm:$0xff]   ;;  %v3582_v1 = vld [vmem:[%s4456_s5 + $0x34] sm:$0xff]   ;;  %v3584_v3 = vld [vmem:[%s4456_s5 + $0x2c] sm:$0xff]   ;;  %vm990_vm14 = vcmask 1046528   ;;  %vm655_vm15 = vcmask 588800   ;;  %s3111_s20 = sshll.u32 %s4474_s19, 4 }
  0x1a   : > { %3259 = vmatpush3.bf16.msra.mxu0 %v3570_v32  ;;  %v1752_v47 = vsel %vm3802_vm6, %v1744_v44, %v1751_v45  ;;  %v3583_v2 = vld [vmem:[%s4456_s5] sm:$0xff]   ;;  %v3587_v35 = vld [vmem:[%s4455_s4 + $0x30] sm:$0xff]   ;;  %v3593_v46 = vld [vmem:[%s4456_s5 + $0x58] sm:$0xff]  }
  0x1b   : > { %3264 = vmatprep.subr.bf16.mxu0 %v3698_v34  ;;  %v3586_v4 = vld [vmem:[%s4456_s5 + $0x24] sm:$0xff]   ;;  %v3600_v56 = vld [vmem:[%s4457_s6 + $0x38] sm:$0xff]  }
  0x1c   : > { %3283 = vmatpush3.bf16.msra.mxu1 %v3573_v36  ;;  %v600_v42 = vld [vmem:[#allocation2] sm:$0xf]  ;;  %v3588_v36 = vld [vmem:[%s4456_s5 + $0x68] ss:$0 sps:$4 sm:$0xff]   ;;  %v3680_v19 = vld [vmem:[%s4457_s6 + $0xb8] sm:$0xff]  }
  0x1d   : > { %v1761_v29 = vld [vmem:[#allocation2 + $0x8] sm:$0x1]  ;;  %3284 = vmatprep.subr.bf16.mxu1 %v3698_v34  ;;  %v601_v43 = vsel %vm3849_vm10, %v583_v39, %v600_v42  ;;  %v1110_v41 = vsel %vm445_vm2, %v3588_v36, 0  ;;  %v3590_v44 = vld [vmem:[%s4456_s5 + $0x60] sm:$0xff]  }
  0x1e   : > { %v3815_v30 = vsel %vm3797_vm5, %v1753_v28, %v1761_v29  ;;  %602 = vst [vmem:[#allocation2] sm:$0xf] %v601_v43  ;;  %v3861_v48 = vld [vmem:[#allocation2 + $0x4] sm:$0xf]  ;;  %v3589_v42 = vld [vmem:[%s4455_s4 + $0x28] sm:$0xff]   ;;  %vm4081_vm5 = vmand %vm445_vm2, %vm598_vm9 }
  0x1f   : > { %v3592_v7 = vld [vmem:[#allocation2 + $0x8] ss:$0 sps:$4 sm:$0x11]   ;;  %v3591_v45 = vld [vmem:[%s4455_s4 + $0x20] sm:$0xff]  }
  0x20   : > { %3285 = vmatpush3.bf16.msra.mxu1 %v3575_v38  ;;  %1763 = vst [vmem:[#allocation2 + $0x8] sm:$0x1] %v3815_v30  ;;  %v806_v11 = vshll.u32 %v3592_v7, 16  ;;  %v992_v18 = vrot.slane %v3592_v7, 1  ;;  %v3585_v30 = vld [vmem:[%s4455_s4 + $0x38] sm:$0xff]   ;;  %v3614_v7 = vld [vmem:[%s4457_s6 + $0x48] sm:$0xff]  }
  0x21   : > { %3302 = vmatprep.subr.bf16.mxu1 %v3698_v34  ;;  %v4068_v36 = vld [vmem:[%s4458_s7] ss:$0 sm:$0xff] }
  0x22   : > { %v808_v13 = vrot.slane %v806_v11, 1 }
  0x25   : > { %v3577_v49 = vld [vmem:[#allocation2] sm:$0xff]  }
  0x26   : > { %v1757_v50 = vld [vmem:[#allocation2] sm:$0xf]  ;;  %1760 = vst.msk [vmem:[#allocation2 + $0x4] sm:$0xf] %vm418_vm8, %v1752_v47  ;;  %3287 = vmatmul.mubr.msk.bf16.vlgmr.msra.gmra.mxu1 %vm732_vm11, %v3577_v49  ;;  %v3594_v47 = vld [vmem:[%s4455_s4 + $0x58] sm:$0xff]   ;;  %v3596_v49 = vld [vmem:[%s4455_s4 + $0x50] sm:$0xff]  }
  0x27   : > { %v1758_v52 = vsel %vm3849_vm10, %v3806_v25, %v1757_v50  ;;  %3303 = vmatpush3.bf16.msra.mxu1 %v932_v51  ;;  %3312 = vmatprep.mubr.msk.bf16.mxu1 %vm3699_vm7, %v3698_v34  ;;  %v777_v5 = vld [vmem:[#allocation2] sm:$0xf]  ;;  %v3597_v50 = vld [vmem:[%s4456_s5 + $0x48] sm:$0xff]   ;;  %vm1209_vm8 = vcmask 1040384  }
  0x28   : > { %3304 = vmatprep.subr.bf16.mxu1 %v3698_v34  ;;  %v2843_v6 = vcombine.low %v777_v5, %v3861_v48  ;;  %v977_v15 = vld [vmem:[#allocation2] sm:$0xe]  ;;  %v3598_v51 = vld [vmem:[%s4455_s4 + $0x48] sm:$0xff]   ;;  %vm4088_vm10 = vmand %vm1209_vm8, %vm574_vm3 }
  0x29   : > { %v2873_v16 = vcombine.low %v977_v15, %v3861_v48  ;;  %1759 = vst [vmem:[#allocation2] sm:$0xf] %v1758_v52  ;;  %v3595_v48 = vld [vmem:[%s4456_s5 + $0x50] sm:$0xff]   ;;  %v3613_v5 = vld [vmem:[%s4457_s6] sm:$0xff]  }
  0x2a   : > { %v801_v8 = vshll.u32 %v2843_v6, 16  ;;  %v799_v9 = vshrl.u32 %v2843_v6, 16  ;;  %v4050_v6 = vld [vmem:[%s3784_s26 + $0x4] sm:$0xf]  ;;  %s4207_s26 = scalar_lea.vmem %s4462_s11, %s3111_s20 }
  0x2b   : > { %3305 = vmatpush3.bf16.msra.mxu1 %v3580_v63  ;;  %v991_v17 = vrot.slane %v2873_v16, 1  ;;  %v3607_v63 = vld [vmem:[%s4457_s6 + $0x18] sm:$0xff]  }
  0x2c   : > { %3306 = vmatprep.subr.bf16.mxu1 %v3698_v34  ;;  %v803_v10 = vrot.slane %v801_v8, 1  ;;  %v3616_v8 = vld [vmem:[%s4457_s6 + $0x40] sm:$0xff]  }
  0x2d   : > { %v3918_v20 = vsel %vm990_vm14, %v991_v17, %v992_v18 }
  0x2e   : > { %v804_v12 = vor.u32 %v803_v10, %v799_v9 }
  0x2f   : > { %3307 = vmatpush3.bf16.msra.mxu1 %v3582_v1  ;;  %v3609_v1 = vld [vmem:[%s4457_s6 + $0x10] sm:$0xff]  }
  0x30   : > { %3308 = vmatprep.subr.bf16.mxu1 %v3698_v34  ;;  %v809_v14 = vsel %vm797_vm13, %v804_v12, %v808_v13 }
  0x33   : > { %3309 = vmatpush3.bf16.msra.mxu1 %v3584_v3  ;;  %v3611_v3 = vld [vmem:[%s4457_s6 + $0x8] sm:$0xff]  }
  0x34   : > { %3310 = vmatprep.subr.bf16.mxu1 %v3698_v34 }
  0x37   : > { %3311 = vmatpush3.bf16.msra.mxu1 %v3586_v4  ;;  %v3612_v4 = vld [vmem:[%s4457_s6 + $0x50] sm:$0xff]  }
  0x38   : > { %3328 = vmatprep.subr.bf16.mxu1 %v3698_v34 }
  0xd5   : > { %v3254_v53 = vpop.f32.mrf.mxu0 }
  0xd6   : > { %v498_v59 = vpack.c.bf16 %v3254_v53, %v3254_v53 }
  0xd7   : > { %v483_v54 = vpop.f32.mrf.mxu0 }
  0xd9   : > { %v3255_v55 = vpop.f32.mrf.mxu0 }
  0xdb   : > { %v486_v57 = vpop.f32.mrf.mxu0 }
  0xdc   : > { %v497_v58 = vpack.c.bf16 %v486_v57, %v483_v54  ;;  %v3599_v54 = vld [vmem:[%s4455_s4 + $0x40] sm:$0xff]   ;;  %v3601_v57 = vld [vmem:[%s4457_s6 + $0x30] sm:$0xff]  }
  0xde   : > { %3260 = vmatprep.mubr.msk.bf16.mxu0 %vm515_vm12, %v497_v58  ;;  %v3602_v58 = vld [vmem:[%s4457_s6 + $0x78] sm:$0xff]  }
  0xdf   : > { %3261 = vmatmul.mubr.msk.bf16.vlgmr.msra.gmra.mxu0 %vm515_vm12, %v498_v59  ;;  %v3603_v59 = vld [vmem:[%s4457_s6 + $0x28] sm:$0xff]  }
  0xe0   : > { %3265 = vmatpush3.bf16.msra.mxu0 %v660_v60  ;;  %3274 = vmatprep.mubr.msk.bf16.mxu0 %vm3699_vm7, %v3698_v34  ;;  %v3604_v60 = vld [vmem:[%s4457_s6 + $0x70] sm:$0xff]  }
  0xe1   : > { %3266 = vmatprep.subr.bf16.mxu0 %v3698_v34 }
  0xe4   : > { %3267 = vmatpush3.bf16.msra.mxu0 %v3576_v61  ;;  %v3605_v61 = vld [vmem:[%s4457_s6 + $0x20] sm:$0xff]  }
  0xe5   : > { %3268 = vmatprep.subr.bf16.mxu0 %v3698_v34 }
  0xe6   : > { %v3920_v21 = vpop.f32.mrf.mxu1 }
  0xe8   : > { %3269 = vmatpush3.bf16.msra.mxu0 %v3579_v62  ;;  %v3288_v22 = vpop.f32.mrf.mxu1  ;;  %v3606_v62 = vld [vmem:[%s4457_s6 + $0x68] sm:$0xff]  }
  0xe9   : > { %3270 = vmatprep.subr.bf16.mxu0 %v3698_v34 }
  0xea   : > { %v3922_v23 = vpop.f32.mrf.mxu1 }
  0xec   : > { %3271 = vmatpush3.bf16.msra.mxu0 %v3581_v0  ;;  %v3289_v24 = vpop.f32.mrf.mxu1  ;;  %v3608_v0 = vld [vmem:[%s4457_s6 + $0x60] sm:$0xff]  }
  0xed   : > { %3272 = vmatprep.subr.bf16.mxu0 %v3698_v34 }
  0xf0   : > { %3273 = vmatpush3.bf16.msra.mxu0 %v3583_v2  ;;  %v3610_v2 = vld [vmem:[%s4457_s6 + $0x58] sm:$0xff]  }
  0xf1   : > { %3290 = vmatprep.subr.bf16.mxu0 %v3698_v34 }
 0x19f   : > { %v3262_v25 = vpop.f32.mrf.mxu0 }
 0x1a0   : > { %v571_v28 = vpack.c.bf16 %v3262_v25, %v3262_v25 }
 0x1a1   : > { %v556_v26 = vpop.f32.mrf.mxu0 }
 0x1a2   : > { %v897_v32 = vshll.u32 %v571_v28, 16  ;;  %v1077_v53 = vrot.slane %v571_v28, 1 }
 0x1a3   : > { %v3263_v27 = vpop.f32.mrf.mxu0 }
 0x1a4   : > { %v899_v39 = vrot.slane %v897_v32, 1 }
 0x1a5   : > { %v559_v29 = vpop.f32.mrf.mxu0 }
 0x1a6   : > { %v570_v31 = vpack.c.bf16 %v559_v29, %v556_v26 }
 0x1a8   : > { %v892_v33 = vshll.u32 %v570_v31, 16  ;;  %3275 = vmatmul.mubr.msk.bf16.vlgmr.msra.gmra.mxu0 %vm655_vm15, %v570_v31  ;;  %v890_v37 = vshrl.u32 %v570_v31, 16  ;;  %v1076_v52 = vrot.slane %v570_v31, 1 }
 0x1a9   : > { %3291 = vmatpush3.bf16.msra.mxu0 %v3585_v30  ;;  %3298 = vmatprep.mubr.msk.bf16.mxu0 %vm3699_vm7, %v3698_v34 }
 0x1aa   : > { %v894_v38 = vrot.slane %v892_v33, 1  ;;  %3292 = vmatprep.subr.bf16.mxu0 %v3698_v34  ;;  %v1078_v55 = vsel %vm990_vm14, %v1076_v52, %v1077_v53 }
 0x1ac   : > { %v895_v40 = vor.u32 %v894_v38, %v890_v37 }
 0x1ad   : > { %3293 = vmatpush3.bf16.msra.mxu0 %v3587_v35 }
 0x1ae   : > { %3294 = vmatprep.subr.bf16.mxu0 %v3698_v34  ;;  %v900_v43 = vsel %vm797_vm13, %v895_v40, %v899_v39 }
 0x1af   : > { %3313 = vmatmul.mubr.msk.bf16.vlgmr.msra.gmra.mxu1 %vm655_vm15, %v900_v43 }
 0x1b0   : > { %3329 = vmatpush3.bf16.msra.mxu1 %v1110_v41  ;;  %3338 = vmatprep.mubr.msk.bf16.mxu1 %vm3699_vm7, %v3698_v34 }
 0x1b1   : > { %3295 = vmatpush3.bf16.msra.mxu0 %v3589_v42  ;;  %3330 = vmatprep.subr.bf16.mxu1 %v3698_v34 }
 0x1b2   : > { %3296 = vmatprep.subr.bf16.mxu0 %v3698_v34 }
 0x1b4   : > { %3331 = vmatpush3.bf16.msra.mxu1 %v3590_v44 }
 0x1b5   : > { %3297 = vmatpush3.bf16.msra.mxu0 %v3591_v45  ;;  %3332 = vmatprep.subr.bf16.mxu1 %v3698_v34 }
 0x1b6   : > { %3316 = vmatprep.subr.bf16.mxu0 %v3698_v34 }
 0x1b8   : > { %3299 = vmatmul.mubr.msk.bf16.vlgmr.msra.gmra.mxu0 %vm732_vm11, %v809_v14  ;;  %3333 = vmatpush3.bf16.msra.mxu1 %v3593_v46 }
 0x1b9   : > { %3317 = vmatpush3.bf16.msra.mxu0 %v3594_v47  ;;  %3334 = vmatprep.subr.bf16.mxu1 %v3698_v34 }
 0x1ba   : > { %3318 = vmatprep.subr.bf16.mxu0 %v3698_v34  ;;  %3324 = vmatprep.mubr.msk.bf16.mxu0 %vm3699_vm7, %v3698_v34 }
 0x1bc   : > { %3335 = vmatpush3.bf16.msra.mxu1 %v3595_v48 }
 0x1bd   : > { %3319 = vmatpush3.bf16.msra.mxu0 %v3596_v49  ;;  %3336 = vmatprep.subr.bf16.mxu1 %v3698_v34 }
 0x1be   : > { %3320 = vmatprep.subr.bf16.mxu0 %v3698_v34 }
 0x1c0   : > { %3337 = vmatpush3.bf16.msra.mxu1 %v3597_v50 }
 0x1c1   : > { %3321 = vmatpush3.bf16.msra.mxu0 %v3598_v51  ;;  %3362 = vmatprep.subr.bf16.mxu1 %v3698_v34 }
 0x1c2   : > { %3322 = vmatprep.subr.bf16.mxu0 %v3698_v34 }
 0x1c3   : > { %3339 = vmatmul.mubr.msk.bf16.vlgmr.msra.gmra.mxu1 %vm655_vm15, %v1078_v55  ;;  %v1205_v55 = vld [vmem:[#allocation3] sm:$0xf] }
 0x1c4   : > { %3378 = vmatprep.mubr.msk.bf16.mxu1 %vm3699_vm7, %v3698_v34  ;;  %3363 = vmatpush3.bf16.msra.mxu1 %v3600_v56 }
 0x1c5   : > { %3323 = vmatpush3.bf16.msra.mxu0 %v3599_v54  ;;  %3364 = vmatprep.subr.bf16.mxu1 %v3698_v34 }
 0x1c6   : > { %3342 = vmatprep.subr.bf16.mxu0 %v3698_v34 }
 0x1c8   : > { %3325 = vmatmul.mubr.msk.bf16.vlgmr.msra.gmra.mxu0 %vm732_vm11, %v3918_v20  ;;  %3365 = vmatpush3.bf16.msra.mxu1 %v3601_v57 }
 0x1c9   : > { %3358 = vmatprep.mubr.msk.bf16.mxu0 %vm3699_vm7, %v3698_v34  ;;  %3366 = vmatprep.subr.bf16.mxu1 %v3698_v34 }
 0x1ca   : > { %3343 = vmatpush3.bf16.msra.mxu0 %v3602_v58 }
 0x1cb   : > { %3344 = vmatprep.subr.bf16.mxu0 %v3698_v34 }
 0x1cc   : > { %3367 = vmatpush3.bf16.msra.mxu1 %v3603_v59 }
 0x1cd   : > { %3368 = vmatprep.subr.bf16.mxu1 %v3698_v34 }
 0x1ce   : > { %3345 = vmatpush3.bf16.msra.mxu0 %v3604_v60 }
 0x1cf   : > { %3346 = vmatprep.subr.bf16.mxu0 %v3698_v34 }
 0x1d0   : > { %3369 = vmatpush3.bf16.msra.mxu1 %v3605_v61 }
 0x1d1   : > { %3370 = vmatprep.subr.bf16.mxu1 %v3698_v34 }
 0x1d2   : > { %3347 = vmatpush3.bf16.msra.mxu0 %v3606_v62  ;;  %v1211_v62 = vld [vmem:[#allocation3 + $0x8] sm:$0x1] }
 0x1d3   : > { %3348 = vmatprep.subr.bf16.mxu0 %v3698_v34 }
 0x1d4   : > { %3371 = vmatpush3.bf16.msra.mxu1 %v3607_v63 }
 0x1d5   : > { %3372 = vmatprep.subr.bf16.mxu1 %v3698_v34 }
 0x1d6   : > { %3349 = vmatpush3.bf16.msra.mxu0 %v3608_v0 }
 0x1d7   : > { %3350 = vmatprep.subr.bf16.mxu0 %v3698_v34 }
 0x1d8   : > { %3373 = vmatpush3.bf16.msra.mxu1 %v3609_v1 }
 0x1d9   : > { %3374 = vmatprep.subr.bf16.mxu1 %v3698_v34 }
 0x1da   : > { %3351 = vmatpush3.bf16.msra.mxu0 %v3610_v2 }
 0x1db   : > { %3352 = vmatprep.subr.bf16.mxu0 %v3698_v34 }
 0x1dc   : > { %3375 = vmatpush3.bf16.msra.mxu1 %v3611_v3 }
 0x1dd   : > { %3376 = vmatprep.subr.bf16.mxu1 %v3698_v34 }
 0x1de   : > { %3353 = vmatpush3.bf16.msra.mxu0 %v3612_v4  ;;  %v3619_v4 = vld [vmem:[%s4453_s2] sm:$0xff]  }
 0x1df   : > { %3354 = vmatprep.subr.bf16.mxu0 %v3698_v34 }
 0x1e0   : > { %3377 = vmatpush3.bf16.msra.mxu1 %v3613_v5 }
 0x1e1   : > { %3555 = vmatprep.subr.msk.bf16.mxu1 %vm445_vm2, %v4050_v6 }
 0x1e2   : > { %3355 = vmatpush3.bf16.msra.mxu0 %v3614_v7 }
 0x1e3   : > { %3356 = vmatprep.subr.bf16.mxu0 %v3698_v34 }
 0x1e6   : > { %3357 = vmatpush3.bf16.msra.mxu0 %v3616_v8 }
 0x1e7   : > { %3382 = vmatprep.subr.bf16.mxu0 %v3698_v34 }
 0x268   : > { %v696_v9 = vpop.f32.mrf.mxu0 }
 0x269   : > { %v771_v24 = vadd.f32 %v3920_v21, %v696_v9  ;;  %v4073_v21 = vld [vmem:[%s4459_s8] ss:$0 sm:$0xff]  ;;  %v1610_v9 = vsel %vm445_vm2, %v4050_v6, 0 }
 0x26a   : > { %v3276_v10 = vpop.f32.mrf.mxu0 }
 0x26c   : > { %v699_v11 = vpop.f32.mrf.mxu0 }
 0x26d   : > { %v774_v27 = vadd.f32 %v3922_v23, %v699_v11 }
 0x26e   : > { %v3277_v12 = vpop.f32.mrf.mxu0 }
 0x26f   : > { %v968_v13 = vpop.f32.mrf.mxu1 }
 0x271   : > { %v3314_v14 = vpop.f32.mrf.mxu1 }
 0x273   : > { %v971_v15 = vpop.f32.mrf.mxu1 }
 0x275   : > { %v3315_v16 = vpop.f32.mrf.mxu1 }
 0x278   : > { %v871_v17 = vpop.f32.mrf.mxu0 }
 0x279   : > { %v878_v25 = vadd.f32 %v871_v17, %v771_v24  ;;  %v3618_v17 = vld [vmem:[%s4457_s6 + $0xb8] sm:$0xff]   ;;  %v3623_v24 = vld [vmem:[%s4457_s6 + $0xa0] sm:$0xff]  }
 0x27a   : > { %v3300_v18 = vpop.f32.mrf.mxu0 }
 0x27b   : > { %v975_v31 = vadd.f32 %v968_v13, %v878_v25  ;;  %v3620_v18 = vld [vmem:[%s4453_s2 + $0x8] ss:$0 sps:$4 sm:$0x11]   ;;  %v3624_v25 = vld [vmem:[%s4457_s6 + $0x98] sm:$0xff]  }
 0x27c   : > { %v874_v20 = vpop.f32.mrf.mxu0 }
 0x27d   : > { %v879_v29 = vadd.f32 %v874_v20, %v774_v27  ;;  %v3621_v20 = vld [vmem:[%s4457_s6 + $0xb0] sm:$0xff]   ;;  %v3626_v27 = vld [vmem:[%s4457_s6 + $0x88] sm:$0xff]  }
 0x27e   : > { %v3301_v22 = vpop.f32.mrf.mxu0 }
 0x27f   : > { %v976_v39 = vadd.f32 %v971_v15, %v879_v29  ;;  %v3622_v22 = vld [vmem:[%s4457_s6 + $0xa8] sm:$0xff]  }
 0x283   : > { %v1146_v26 = vpop.f32.mrf.mxu1 }
 0x285   : > { %v3340_v28 = vpop.f32.mrf.mxu1 }
 0x287   : > { %v1149_v30 = vpop.f32.mrf.mxu1 }
 0x288   : > { %v1055_v32 = vpop.f32.mrf.mxu0 }
 0x289   : > { %v1062_v33 = vadd.f32 %v1055_v32, %v975_v31  ;;  %v3341_v35 = vpop.f32.mrf.mxu1 }
 0x28a   : > { %v3326_v37 = vpop.f32.mrf.mxu0  ;;  %v3629_v35 = vld [vmem:[%s4454_s3 + $0x8] sm:$0xff]  }
 0x28b   : > { %v1153_v38 = vadd.f32 %v1146_v26, %v1062_v33  ;;  %v3625_v26 = vld [vmem:[%s4457_s6 + $0x90] sm:$0xff]   ;;  %v3630_v37 = vld [vmem:[%s4454_s3] sm:$0xff]  }
 0x28c   : > { %v1058_v23 = vpop.f32.mrf.mxu0 }
 0x28d   : > { %v1162_v40 = vadd.f32 %v4068_v36, %v1153_v38  ;;  %v1063_v41 = vadd.f32 %v1058_v23, %v976_v39  ;;  %v3631_v38 = vld [vmem:[%s4455_s4 + $0x18] sm:$0xff]   ;;  %v3632_v39 = vld [vmem:[%s4455_s4 + $0x10] sm:$0xff]   ;;  %v3633_v23 = vld [vmem:[%s4455_s4 + $0x8] sm:$0xff]  }
 0x28e   : > { %v3327_v42 = vpop.f32.mrf.mxu0 }
 0x28f   : > { %vm1164_vm0 = vcmp.ge.f32.partialorder %v1162_v40, 0.0  ;;  %v1173_v43 = vmul.f32 %v4073_v21, %v1162_v40  ;;  %v1154_v44 = vadd.f32 %v1149_v30, %v1063_v41  ;;  %v3627_v30 = vld [vmem:[%s4457_s6 + $0x80] sm:$0xff]  }
 0x290   : > { %v3638_v41 = vld [vmem:[%s4456_s5 + $0x44] ss:$0 sps:$4 sm:$0xff]  }
 0x291   : > { %v1175_v45 = vsel %vm1164_vm0, %v1162_v40, %v1173_v43  ;;  %v1163_v46 = vadd.f32 %v4068_v36, %v1154_v44  ;;  %v3635_v40 = vld [vmem:[%s4455_s4] sm:$0xff]   ;;  %v2082_v43 = vsel %vm445_vm2, %v3638_v41, 0 }
 0x292   : > { %v3112_v47 = vpack.c.bf16 %v1175_v45, %v1175_v45  ;;  %v3637_v42 = vld [vmem:[#allocation2] sm:$0xff]  }
 0x293   : > { %vm1165_vm4 = vcmp.ge.f32.partialorder %v1163_v46, 0.0  ;;  %v1174_v48 = vmul.f32 %v4073_v21, %v1163_v46 }
 0x294   : > { %v1184_v49 = vshrl.u32 %v3112_v47, 16  ;;  %v1187_v52 = vshll.u32 %v3112_v47, 16 }
 0x295   : > { %v1176_v50 = vsel %vm1165_vm4, %v1163_v46, %v1174_v48 }
 0x296   : > { %v1186_v51 = vrot.slane %v1184_v49, 7  ;;  %v3113_v53 = vpack.c.bf16 %v1176_v50, %v1176_v50 }
 0x298   : > { %v1189_v56 = vor.u32 %v1187_v52, %v1186_v51  ;;  %v1192_v57 = vshrl.u32 %v3113_v53, 16  ;;  %v1195_v60 = vshll.u32 %v3113_v53, 16  ;;  %v1190_v63 = vrot.slane %v1186_v51, 4 }
 0x29a   : > { %v1206_v58 = vsel %vm4081_vm5, %v1189_v56, %v1205_v55  ;;  %v1194_v59 = vrot.slane %v1192_v57, 7  ;;  %v3634_v55 = vld [vmem:[%s4456_s5 + $0x20] ss:$0 sps:$4 sm:$0xff]  }
 0x29b   : > { %1207 = vst [vmem:[#allocation3] sm:$0xf] %v1206_v58 }
 0x29c   : > { %v1197_v0 = vor.u32 %v1195_v60, %v1194_v59  ;;  %v1199_v1 = vrot.slane %v1194_v59, 4  ;;  %v1814_v60 = vsel %vm445_vm2, %v3634_v55, 0 }
 0x29e   : > { %v1198_v2 = vsel %vm3802_vm6, %v1190_v63, %v1197_v0  ;;  %v1212_v3 = vsel %vm4088_vm10, %v1199_v1, %v1211_v62  ;;  %v3636_v62 = vld [vmem:[%s4456_s5 + $0x18] sm:$0xff]   ;;  %v3639_v63 = vld [vmem:[%s4456_s5 + $0x10] sm:$0xff]  }
 0x29f   : > { %1208 = vst [vmem:[#allocation3 + $0x4] sm:$0xf] %v1198_v2  ;;  %1213 = vst [vmem:[#allocation3 + $0x8] sm:$0x1] %v1212_v3  ;;  %v4195_v2 = vld [vmem:[%s4460_s9] ss:$0 sm:$0xff] }
 0x2a2   : > { %v1214_v5 = vld [vmem:[#allocation3] sm:$0xf] }
 0x2a3   : > { %v1450_v28 = vld [vmem:[#allocation3] sm:$0xe] }
 0x2a6   : > { %v1215_v7 = vld [vmem:[#allocation3 + $0x4] sm:$0xf]  ;;  %v3617_v10 = vld [vmem:[#allocation3 + $0x8] ss:$0 sps:$4 sm:$0x11]  }
 0x2a7   : > { %v2914_v8 = vcombine.low %v1214_v5, %v1215_v7  ;;  %v1266_v12 = vshll.u32 %v3617_v10, 16  ;;  %v2948_v29 = vcombine.low %v1450_v28, %v1215_v7  ;;  %v1472_v32 = vrot.slane %v3617_v10, 1 }
 0x2a9   : > { %3379 = vmatmul.mubr.bf16.vlgmr.msra.gmra.mxu1 %v2914_v8  ;;  %v1261_v11 = vshll.u32 %v2914_v8, 16  ;;  %v1259_v13 = vshrl.u32 %v2914_v8, 16  ;;  %v1268_v16 = vrot.slane %v1266_v12, 1  ;;  %v1471_v31 = vrot.slane %v2948_v29, 1 }
 0x2aa   : > { %3403 = vmatpush3.bf16.msra.mxu1 %v1610_v9  ;;  %3404 = vmatprep.mubr.msk.bf16.mxu1 %vm438_vm1, %v3619_v4  ;;  %v4201_v4 = vld [vmem:[%s4461_s10] ss:$0 sm:$0xff] }
 0x2ab   : > { %v1263_v14 = vrot.slane %v1261_v11, 1  ;;  %v1473_v33 = vsel %vm990_vm14, %v1471_v31, %v1472_v32  ;;  %3408 = vmatprep.subr.bf16.mxu1 %v3629_v35  ;;  %v1930_v31 = vld [vmem:[#allocation2] sm:$0xf]  ;;  %v4242_v32 = vld [vmem:[#allocation2 + $0x4] sm:$0xf] }
 0x2ad   : > { %v1264_v15 = vor.u32 %v1263_v14, %v1259_v13 }
 0x2af   : > { %v1269_v6 = vsel %vm797_vm13, %v1264_v15, %v1268_v16 }
 0x2b0   : > { %3359 = vmatmul.mubr.bf16.vlgmr.msra.gmra.mxu0 %v1269_v6  ;;  %v3642_v6 = vld [vmem:[%s4456_s5 + $0x34] sm:$0xff]  }
 0x2b1   : > { %3383 = vmatpush3.bf16.msra.mxu0 %v3618_v17  ;;  %3405 = vmatmul.mubr.msk.bf16.vlgmr.msra.gmra.mxu1 %vm438_vm1, %v3620_v18  ;;  %v3640_v17 = vld [vmem:[%s4456_s5 + $0x3c] sm:$0xff]   ;;  %v3641_v18 = vld [vmem:[%s4456_s5 + $0x8] sm:$0xff]  }
 0x2b2   : > { %3384 = vmatprep.subr.bf16.mxu0 %v3698_v34  ;;  %3398 = vmatprep.mubr.msk.bf16.mxu0 %vm3699_vm7, %v3698_v34 }
 0x2b3   : > { %3409 = vmatpush3.bf16.msra.mxu1 %v3629_v35 }
 0x2b4   : > { %3410 = vmatprep.subr.bf16.mxu1 %v3630_v37 }
 0x2b5   : > { %3385 = vmatpush3.bf16.msra.mxu0 %v3621_v20  ;;  %v3643_v20 = vld [vmem:[%s4456_s5] sm:$0xff]  }
 0x2b6   : > { %3386 = vmatprep.subr.bf16.mxu0 %v3698_v34 }
 0x2b7   : > { %3411 = vmatpush3.bf16.msra.mxu1 %v3630_v37 }
 0x2b8   : > { %3416 = vmatprep.subr.bf16.mxu1 %v3698_v34 }
 0x2b9   : > { %3387 = vmatpush3.bf16.msra.mxu0 %v3622_v22  ;;  %v3644_v22 = vld [vmem:[%s4456_s5 + $0x2c] sm:$0xff]  }
 0x2ba   : > { %3388 = vmatprep.subr.bf16.mxu0 %v3698_v34 }
 0x2bd   : > { %3389 = vmatpush3.bf16.msra.mxu0 %v3623_v24  ;;  %v3646_v24 = vld [vmem:[%s4456_s5 + $0x24] sm:$0xff]  }
 0x2be   : > { %3390 = vmatprep.subr.bf16.mxu0 %v3698_v34 }
 0x2c1   : > { %3391 = vmatpush3.bf16.msra.mxu0 %v3624_v25 }
 0x2c2   : > { %3392 = vmatprep.subr.bf16.mxu0 %v3698_v34 }
 0x2c5   : > { %3393 = vmatpush3.bf16.msra.mxu0 %v3625_v26 }
 0x2c6   : > { %3394 = vmatprep.subr.bf16.mxu0 %v3698_v34 }
 0x2c9   : > { %3395 = vmatpush3.bf16.msra.mxu0 %v3626_v27 }
 0x2ca   : > { %3396 = vmatprep.subr.bf16.mxu0 %v3698_v34 }
 0x2cd   : > { %3397 = vmatpush3.bf16.msra.mxu0 %v3627_v30 }
 0x2ce   : > { %3430 = vmatprep.subr.bf16.mxu0 %v3698_v34 }
 0x2d0   : > { %3399 = vmatmul.mubr.bf16.vlgmr.msra.gmra.mxu0 %v1473_v33 }
 0x2d1   : > { %3438 = vmatprep.mubr.msk.bf16.mxu0 %vm3699_vm7, %v3698_v34  ;;  %3431 = vmatpush3.bf16.msra.mxu0 %v3631_v38  ;;  %v3645_v38 = vld [vmem:[%s4455_s4 + $0x38] sm:$0xff]  }
 0x2d2   : > { %3432 = vmatprep.subr.bf16.mxu0 %v3698_v34 }
 0x2d5   : > { %3433 = vmatpush3.bf16.msra.mxu0 %v3632_v39  ;;  %v2990_v39 = vcombine.low %v1930_v31, %v4242_v32  ;;  %v3672_v31 = vld [vmem:[%s4457_s6 + $0x58] sm:$0xff]  }
 0x2d6   : > { %3434 = vmatprep.subr.bf16.mxu0 %v3698_v34 }
 0x2d9   : > { %3435 = vmatpush3.bf16.msra.mxu0 %v3633_v23 }
 0x2da   : > { %3436 = vmatprep.subr.bf16.mxu0 %v3698_v34 }
 0x2dd   : > { %3437 = vmatpush3.bf16.msra.mxu0 %v3635_v40 }
 0x2de   : > { %3454 = vmatprep.subr.bf16.mxu0 %v3698_v34 }
 0x2e0   : > { %3439 = vmatmul.mubr.msk.bf16.vlgmr.msra.gmra.mxu0 %vm732_vm11, %v3637_v42  ;;  %v3647_v42 = vld [vmem:[%s4455_s4 + $0x30] sm:$0xff]  }
 0x2e1   : > { %3455 = vmatpush3.bf16.msra.mxu0 %v2082_v43  ;;  %3464 = vmatprep.mubr.msk.bf16.mxu0 %vm3699_vm7, %v3698_v34  ;;  %v3648_v43 = vld [vmem:[%s4456_s5 + $0x68] ss:$0 sps:$4 sm:$0xff]  }
 0x2e2   : > { %3456 = vmatprep.subr.bf16.mxu0 %v3698_v34 }
 0x2e5   : > { %3457 = vmatpush3.bf16.msra.mxu0 %v3640_v17  ;;  %v3662_v17 = vld [vmem:[%s4457_s6 + $0x38] sm:$0xff]  }
 0x2e6   : > { %3458 = vmatprep.subr.bf16.mxu0 %v3698_v34 }
 0x2e9   : > { %3459 = vmatpush3.bf16.msra.mxu0 %v3642_v6  ;;  %v3664_v6 = vld [vmem:[%s4457_s6 + $0x78] sm:$0xff]  }
 0x2ea   : > { %3460 = vmatprep.subr.bf16.mxu0 %v3698_v34 }
 0x2ed   : > { %3461 = vmatpush3.bf16.msra.mxu0 %v3644_v22  ;;  %v3666_v22 = vld [vmem:[%s4457_s6 + $0x70] sm:$0xff]  }
 0x2ee   : > { %3462 = vmatprep.subr.bf16.mxu0 %v3698_v34 }
 0x2f1   : > { %3463 = vmatpush3.bf16.msra.mxu0 %v3646_v24  ;;  %v3667_v24 = vld [vmem:[%s4457_s6 + $0x20] sm:$0xff]  }
 0x2f2   : > { %3480 = vmatprep.subr.bf16.mxu0 %v3698_v34 }
 0x369   : > { %v1443_v44 = vpop.f32.mrf.mxu1 }
 0x36b   : > { %v3380_v45 = vpop.f32.mrf.mxu1 }
 0x36c   : > { %v1952_v45 = vshll.u32 %v2990_v39, 16 }
 0x36d   : > { %v1446_v46 = vpop.f32.mrf.mxu1 }
 0x36f   : > { %v3381_v47 = vpop.f32.mrf.mxu1 }
 0x370   : > { %v1353_v48 = vpop.f32.mrf.mxu0 }
 0x371   : > { %v3406_v49 = vpop.f32.mrf.mxu1  ;;  %v1444_v0 = vadd.f32 %v1443_v44, %v1353_v48  ;;  %v4264_v44 = vld [vmem:[#allocation2 + $0x8] ss:$0 sps:$4 sm:$0x11]  }
 0x372   : > { %v3360_v50 = vpop.f32.mrf.mxu0  ;;  %v1661_v59 = vpack.c.bf16 %v3406_v49, %v3406_v49  ;;  %v1957_v55 = vshll.u32 %v4264_v44, 16 }
 0x373   : > { %v1646_v51 = vpop.f32.mrf.mxu1  ;;  %v2257_v50 = vsel %vm445_vm2, %v3648_v43, 0 }
 0x374   : > { %v1356_v52 = vpop.f32.mrf.mxu0 }
 0x375   : > { %v3407_v53 = vpop.f32.mrf.mxu1  ;;  %v1447_v7 = vadd.f32 %v1446_v46, %v1356_v52  ;;  %v1950_v52 = vshrl.u32 %v2990_v39, 16 }
 0x376   : > { %v3361_v56 = vpop.f32.mrf.mxu0  ;;  %v1954_v53 = vrot.slane %v1952_v45, 1 }
 0x377   : > { %v1649_v57 = vpop.f32.mrf.mxu1 }
 0x378   : > { %v1660_v58 = vpack.c.bf16 %v1649_v57, %v1646_v51  ;;  %v3649_v51 = vld [vmem:[%s4455_s4 + $0x28] sm:$0xff]   ;;  %v3650_v57 = vld [vmem:[%s4456_s5 + $0x60] sm:$0xff]  }
 0x37a   : > { %3412 = vmatprep.mubr.msk.bf16.mxu1 %vm515_vm12, %v1660_v58  ;;  %v3651_v58 = vld [vmem:[%s4455_s4 + $0x20] sm:$0xff]  }
 0x37b   : > { %3413 = vmatmul.mubr.msk.bf16.vlgmr.msra.gmra.mxu1 %vm515_vm12, %v1661_v59  ;;  %v1955_v59 = vor.u32 %v1954_v53, %v1950_v52 }
 0x37c   : > { %3417 = vmatpush3.bf16.msra.mxu1 %v1814_v60  ;;  %3426 = vmatprep.mubr.msk.bf16.mxu1 %vm3699_vm7, %v3698_v34  ;;  %v1959_v60 = vrot.slane %v1957_v55, 1 }
 0x37d   : > { %3418 = vmatprep.subr.bf16.mxu1 %v3698_v34 }
 0x380   : > { %3419 = vmatpush3.bf16.msra.mxu1 %v3636_v62  ;;  %v3654_v62 = vld [vmem:[%s4456_s5 + $0x58] sm:$0xff]  }
 0x381   : > { %3420 = vmatprep.subr.bf16.mxu1 %v3698_v34 }
 0x384   : > { %3421 = vmatpush3.bf16.msra.mxu1 %v3639_v63  ;;  %v1960_v63 = vsel %vm797_vm13, %v1955_v59, %v1959_v60 }
 0x385   : > { %3422 = vmatprep.subr.bf16.mxu1 %v3698_v34 }
 0x388   : > { %3423 = vmatpush3.bf16.msra.mxu1 %v3641_v18  ;;  %v3663_v18 = vld [vmem:[%s4457_s6 + $0x30] sm:$0xff]  }
 0x389   : > { %3424 = vmatprep.subr.bf16.mxu1 %v3698_v34 }
 0x38c   : > { %3425 = vmatpush3.bf16.msra.mxu1 %v3643_v20  ;;  %v3665_v20 = vld [vmem:[%s4457_s6 + $0x28] sm:$0xff]  }
 0x38d   : > { %3442 = vmatprep.subr.bf16.mxu1 %v3698_v34 }
 0x390   : > { %v1557_v1 = vpop.f32.mrf.mxu0 }
 0x391   : > { %v1564_v3 = vadd.f32 %v1557_v1, %v1444_v0  ;;  %v3655_v0 = vld [vmem:[%s4455_s4 + $0x58] sm:$0xff]   ;;  %v3656_v1 = vld [vmem:[%s4456_s5 + $0x50] sm:$0xff]  }
 0x392   : > { %v3400_v5 = vpop.f32.mrf.mxu0 }
 0x393   : > { %v1573_v8 = vadd.f32 %v4195_v2, %v1564_v3  ;;  %v3657_v3 = vld [vmem:[%s4455_s4 + $0x50] sm:$0xff]   ;;  %v2127_v5 = vld [vmem:[#allocation2] sm:$0xe] }
 0x394   : > { %v1560_v9 = vpop.f32.mrf.mxu0 }
 0x395   : > { %vm1575_vm1 = vcmp.ge.f32.partialorder %v1573_v8, 0.0  ;;  %v1584_v10 = vmul.f32 %v4201_v4, %v1573_v8  ;;  %v1565_v11 = vadd.f32 %v1560_v9, %v1447_v7  ;;  %v3658_v7 = vld [vmem:[%s4456_s5 + $0x48] sm:$0xff]   ;;  %v3020_v9 = vcombine.low %v2127_v5, %v4242_v32 }
 0x396   : > { %v3401_v12 = vpop.f32.mrf.mxu0  ;;  %v3673_v32 = vld [vmem:[%s4457_s6 + $0x8] sm:$0xff]  }
 0x397   : > { %v1586_v13 = vsel %vm1575_vm1, %v1573_v8, %v1584_v10  ;;  %v1574_v14 = vadd.f32 %v4195_v2, %v1565_v11  ;;  %v3659_v8 = vld [vmem:[%s4455_s4 + $0x48] sm:$0xff]   ;;  %v3660_v12 = vld [vmem:[%s4455_s4 + $0x40] sm:$0xff]  }
 0x398   : > { %1588 = vst [vmem:[%s4207_s26] sm:$0xff] %v1586_v13  ;;  %v2139_v13 = vrot.slane %v3020_v9, 1 }
 0x399   : > { %vm1576_vm3 = vcmp.ge.f32.partialorder %v1574_v14, 0.0  ;;  %v1585_v15 = vmul.f32 %v4201_v4, %v1574_v14 }
 0x39b   : > { %v1587_v16 = vsel %vm1576_vm3, %v1574_v14, %v1585_v15  ;;  %v2140_v14 = vrot.slane %v4264_v44, 1 }
 0x39c   : > { %1589 = vst [vmem:[%s4207_s26 + $0x8] sm:$0xff] %v1587_v16 }
 0x39d   : > { %v2141_v16 = vsel %vm990_vm14, %v2139_v13, %v2140_v14 }
 0x3a0   : > { %v4238_v25 = vpop.f32.mrf.mxu0 }
 0x3a2   : > { %v3440_v26 = vpop.f32.mrf.mxu0 }
 0x3a3   : > { %v3668_v26 = vld [vmem:[%s4457_s6 + $0x68] sm:$0xff]  }
 0x3a4   : > { %v4240_v27 = vpop.f32.mrf.mxu0 }
 0x3a6   : > { %v3441_v28 = vpop.f32.mrf.mxu0 }
 0x3a7   : > { %v3669_v28 = vld [vmem:[%s4457_s6 + $0x18] sm:$0xff]  }
 0x43b   : > { %v3414_v29 = vpop.f32.mrf.mxu1 }
 0x43c   : > { %v4244_v35 = vpack.c.bf16 %v3414_v29, %v3414_v29  ;;  %v3670_v29 = vld [vmem:[%s4457_s6 + $0x60] sm:$0xff]  }
 0x43d   : > { %v1718_v30 = vpop.f32.mrf.mxu1 }
 0x43e   : > { %v2047_v40 = vshll.u32 %v4244_v35, 16  ;;  %v2224_v11 = vrot.slane %v4244_v35, 1  ;;  %v3675_v35 = vld [vmem:[%s4457_s6] sm:$0xff]  }
 0x43f   : > { %v3415_v33 = vpop.f32.mrf.mxu1 }
 0x440   : > { %v2049_v48 = vrot.slane %v2047_v40, 1  ;;  %v3674_v33 = vld [vmem:[%s4457_s6 + $0x50] sm:$0xff]  }
 0x441   : > { %v1721_v37 = vpop.f32.mrf.mxu1 }
 0x442   : > { %v4250_v23 = vpack.c.bf16 %v1721_v37, %v1718_v30  ;;  %v3671_v30 = vld [vmem:[%s4457_s6 + $0x10] sm:$0xff]   ;;  %v3676_v37 = vld [vmem:[%s4457_s6 + $0x48] sm:$0xff]  }
 0x444   : > { %v2042_v41 = vshll.u32 %v4250_v23, 16  ;;  %3427 = vmatmul.mubr.msk.bf16.vlgmr.msra.gmra.mxu1 %vm655_vm15, %v4250_v23  ;;  %v2040_v46 = vshrl.u32 %v4250_v23, 16  ;;  %v2223_v10 = vrot.slane %v4250_v23, 1 }
 0x445   : > { %3443 = vmatpush3.bf16.msra.mxu1 %v3645_v38  ;;  %3450 = vmatprep.mubr.msk.bf16.mxu1 %vm3699_vm7, %v3698_v34  ;;  %v3678_v38 = vld [vmem:[%s4457_s6 + $0x40] sm:$0xff]  }
 0x446   : > { %v2044_v47 = vrot.slane %v2042_v41, 1  ;;  %3444 = vmatprep.subr.bf16.mxu1 %v3698_v34  ;;  %v2225_v15 = vsel %vm990_vm14, %v2223_v10, %v2224_v11 }
 0x448   : > { %v2045_v49 = vor.u32 %v2044_v47, %v2040_v46 }
 0x449   : > { %3445 = vmatpush3.bf16.msra.mxu1 %v3647_v42 }
 0x44a   : > { %3446 = vmatprep.subr.bf16.mxu1 %v3698_v34  ;;  %v2050_v56 = vsel %vm797_vm13, %v2045_v49, %v2049_v48 }
 0x44b   : > { %3465 = vmatmul.mubr.msk.bf16.vlgmr.msra.gmra.mxu0 %vm655_vm15, %v2050_v56 }
 0x44c   : > { %3481 = vmatpush3.bf16.msra.mxu0 %v2257_v50  ;;  %3490 = vmatprep.mubr.msk.bf16.mxu0 %vm3699_vm7, %v3698_v34 }
 0x44d   : > { %3447 = vmatpush3.bf16.msra.mxu1 %v3649_v51  ;;  %3482 = vmatprep.subr.bf16.mxu0 %v3698_v34 }
 0x44e   : > { %3448 = vmatprep.subr.bf16.mxu1 %v3698_v34 }
 0x450   : > { %3483 = vmatpush3.bf16.msra.mxu0 %v3650_v57 }
 0x451   : > { %3449 = vmatpush3.bf16.msra.mxu1 %v3651_v58  ;;  %3484 = vmatprep.subr.bf16.mxu0 %v3698_v34 }
 0x452   : > { %3468 = vmatprep.subr.bf16.mxu1 %v3698_v34 }
 0x454   : > { %3451 = vmatmul.mubr.msk.bf16.vlgmr.msra.gmra.mxu1 %vm732_vm11, %v1960_v63  ;;  %3485 = vmatpush3.bf16.msra.mxu0 %v3654_v62 }
 0x455   : > { %3469 = vmatpush3.bf16.msra.mxu1 %v3655_v0  ;;  %3486 = vmatprep.subr.bf16.mxu0 %v3698_v34 }
 0x456   : > { %3470 = vmatprep.subr.bf16.mxu1 %v3698_v34  ;;  %3476 = vmatprep.mubr.msk.bf16.mxu1 %vm3699_vm7, %v3698_v34 }
 0x458   : > { %3487 = vmatpush3.bf16.msra.mxu0 %v3656_v1 }
 0x459   : > { %3471 = vmatpush3.bf16.msra.mxu1 %v3657_v3  ;;  %3488 = vmatprep.subr.bf16.mxu0 %v3698_v34 }
 0x45a   : > { %3472 = vmatprep.subr.bf16.mxu1 %v3698_v34 }
 0x45c   : > { %3489 = vmatpush3.bf16.msra.mxu0 %v3658_v7 }
 0x45d   : > { %3473 = vmatpush3.bf16.msra.mxu1 %v3659_v8  ;;  %3514 = vmatprep.subr.bf16.mxu0 %v3698_v34 }
 0x45e   : > { %3474 = vmatprep.subr.bf16.mxu1 %v3698_v34 }
 0x45f   : > { %3491 = vmatmul.mubr.msk.bf16.vlgmr.msra.gmra.mxu0 %vm655_vm15, %v2225_v15 }
 0x460   : > { %3530 = vmatprep.mubr.msk.bf16.mxu0 %vm3699_vm7, %v3698_v34  ;;  %3515 = vmatpush3.bf16.msra.mxu0 %v3662_v17 }
 0x461   : > { %3475 = vmatpush3.bf16.msra.mxu1 %v3660_v12  ;;  %3516 = vmatprep.subr.bf16.mxu0 %v3698_v34 }
 0x462   : > { %3494 = vmatprep.subr.bf16.mxu1 %v3698_v34 }
 0x464   : > { %3477 = vmatmul.mubr.msk.bf16.vlgmr.msra.gmra.mxu1 %vm732_vm11, %v2141_v16  ;;  %3517 = vmatpush3.bf16.msra.mxu0 %v3663_v18 }
 0x465   : > { %3510 = vmatprep.mubr.msk.bf16.mxu1 %vm3699_vm7, %v3698_v34  ;;  %3518 = vmatprep.subr.bf16.mxu0 %v3698_v34 }
 0x466   : > { %3495 = vmatpush3.bf16.msra.mxu1 %v3664_v6 }
 0x467   : > { %3496 = vmatprep.subr.bf16.mxu1 %v3698_v34 }
 0x468   : > { %3519 = vmatpush3.bf16.msra.mxu0 %v3665_v20  ;;  %v2350_v20 = vld [vmem:[#allocation3] sm:$0xf] }
 0x469   : > { %3520 = vmatprep.subr.bf16.mxu0 %v3698_v34 }
 0x46a   : > { %3497 = vmatpush3.bf16.msra.mxu1 %v3666_v22 }
 0x46b   : > { %3498 = vmatprep.subr.bf16.mxu1 %v3698_v34 }
 0x46c   : > { %3521 = vmatpush3.bf16.msra.mxu0 %v3667_v24 }
 0x46d   : > { %3522 = vmatprep.subr.bf16.mxu0 %v3698_v34 }
 0x46e   : > { %3499 = vmatpush3.bf16.msra.mxu1 %v3668_v26 }
 0x46f   : > { %3500 = vmatprep.subr.bf16.mxu1 %v3698_v34 }
 0x470   : > { %3523 = vmatpush3.bf16.msra.mxu0 %v3669_v28 }
 0x471   : > { %3524 = vmatprep.subr.bf16.mxu0 %v3698_v34 }
 0x472   : > { %3501 = vmatpush3.bf16.msra.mxu1 %v3670_v29 }
 0x473   : > { %3502 = vmatprep.subr.bf16.mxu1 %v3698_v34 }
 0x474   : > { %3525 = vmatpush3.bf16.msra.mxu0 %v3671_v30  ;;  %v2354_v30 = vld [vmem:[#allocation3 + $0x8] sm:$0x1] }
 0x475   : > { %3526 = vmatprep.subr.bf16.mxu0 %v3698_v34 }
 0x476   : > { %3503 = vmatpush3.bf16.msra.mxu1 %v3672_v31 }
 0x477   : > { %3504 = vmatprep.subr.bf16.mxu1 %v3698_v34 }
 0x478   : > { %3527 = vmatpush3.bf16.msra.mxu0 %v3673_v32 }
 0x479   : > { %3528 = vmatprep.subr.bf16.mxu0 %v3698_v34 }
 0x47a   : > { %3505 = vmatpush3.bf16.msra.mxu1 %v3674_v33 }
 0x47b   : > { %3506 = vmatprep.subr.bf16.mxu1 %v3698_v34 }
 0x47c   : > { %3529 = vmatpush3.bf16.msra.mxu0 %v3675_v35 }
 0x47e   : > { %3507 = vmatpush3.bf16.msra.mxu1 %v3676_v37 }
 0x47f   : > { %3508 = vmatprep.subr.bf16.mxu1 %v3698_v34 }
 0x482   : > { %3509 = vmatpush3.bf16.msra.mxu1 %v3678_v38 }
 0x483   : > { %3534 = vmatprep.subr.bf16.mxu1 %v3698_v34 }
 0x504   : > { %v1850_v39 = vpop.f32.mrf.mxu1 }
 0x505   : > { %v1924_v50 = vadd.f32 %v4238_v25, %v1850_v39 }
 0x506   : > { %v3428_v23 = vpop.f32.mrf.mxu1 }
 0x508   : > { %v1853_v40 = vpop.f32.mrf.mxu1 }
 0x509   : > { %v1927_v53 = vadd.f32 %v4240_v27, %v1853_v40 }
 0x50a   : > { %v3429_v41 = vpop.f32.mrf.mxu1 }
 0x50b   : > { %v2118_v42 = vpop.f32.mrf.mxu0 }
 0x50d   : > { %v3466_v43 = vpop.f32.mrf.mxu0 }
 0x50e   : > { %v3682_v43 = vld [vmem:[%s4457_s6 + $0xa8] sm:$0xff]  }
 0x50f   : > { %v2121_v44 = vpop.f32.mrf.mxu0 }
 0x511   : > { %v3467_v45 = vpop.f32.mrf.mxu0 }
 0x512   : > { %v3684_v45 = vld [vmem:[%s4457_s6 + $0x98] sm:$0xff]  }
 0x514   : > { %v2022_v46 = vpop.f32.mrf.mxu1 }
 0x515   : > { %v2029_v51 = vadd.f32 %v2022_v46, %v1924_v50  ;;  %v3685_v46 = vld [vmem:[%s4457_s6 + $0x90] sm:$0xff]   ;;  %v3687_v50 = vld [vmem:[%s4457_s6 + $0x80] sm:$0xff]  }
 0x516   : > { %v3452_v47 = vpop.f32.mrf.mxu1 }
 0x517   : > { %v2125_v58 = vadd.f32 %v2118_v42, %v2029_v51  ;;  %v3681_v42 = vld [vmem:[%s4457_s6 + $0xb0] sm:$0xff]   ;;  %v3686_v47 = vld [vmem:[%s4457_s6 + $0x88] sm:$0xff]  }
 0x518   : > { %v2025_v48 = vpop.f32.mrf.mxu1 }
 0x519   : > { %v2030_v56 = vadd.f32 %v2025_v48, %v1927_v53 }
 0x51a   : > { %v3453_v49 = vpop.f32.mrf.mxu1 }
 0x51b   : > { %v2126_v1 = vadd.f32 %v2121_v44, %v2030_v56  ;;  %v3683_v44 = vld [vmem:[%s4457_s6 + $0xa0] sm:$0xff]  }
 0x51f   : > { %v2293_v52 = vpop.f32.mrf.mxu0 }
 0x521   : > { %v3492_v55 = vpop.f32.mrf.mxu0 }
 0x523   : > { %v2296_v57 = vpop.f32.mrf.mxu0 }
 0x524   : > { %v2203_v59 = vpop.f32.mrf.mxu1 }
 0x525   : > { %v2210_v60 = vadd.f32 %v2203_v59, %v2125_v58  ;;  %v3493_v62 = vpop.f32.mrf.mxu0 }
 0x526   : > { %v3478_v63 = vpop.f32.mrf.mxu1 }
 0x527   : > { %v2300_v0 = vadd.f32 %v2293_v52, %v2210_v60 }
 0x528   : > { %v2206_v3 = vpop.f32.mrf.mxu1 }
 0x529   : > { %v2309_v5 = vadd.f32 %v4068_v36, %v2300_v0  ;;  %v2211_v7 = vadd.f32 %v2206_v3, %v2126_v1 }
 0x52a   : > { %v3479_v8 = vpop.f32.mrf.mxu1 }
 0x52b   : > { %vm2311_vm2 = vcmp.ge.f32.partialorder %v2309_v5, 0.0  ;;  %v2320_v25 = vmul.f32 %v4073_v21, %v2309_v5  ;;  %v2301_v9 = vadd.f32 %v2296_v57, %v2211_v7 }
 0x52d   : > { %v2322_v27 = vsel %vm2311_vm2, %v2309_v5, %v2320_v25  ;;  %v2310_v10 = vadd.f32 %v4068_v36, %v2301_v9 }
 0x52e   : > { %v3114_v11 = vpack.c.bf16 %v2322_v27, %v2322_v27 }
 0x52f   : > { %vm2312_vm9 = vcmp.ge.f32.partialorder %v2310_v10, 0.0  ;;  %v2321_v12 = vmul.f32 %v4073_v21, %v2310_v10 }
 0x530   : > { %v2331_v13 = vshrl.u32 %v3114_v11, 16  ;;  %v2334_v16 = vshll.u32 %v3114_v11, 16 }
 0x531   : > { %v2323_v14 = vsel %vm2312_vm9, %v2310_v10, %v2321_v12 }
 0x532   : > { %v2333_v15 = vrot.slane %v2331_v13, 7  ;;  %v3115_v17 = vpack.c.bf16 %v2323_v14, %v2323_v14 }
 0x534   : > { %v2336_v18 = vor.u32 %v2334_v16, %v2333_v15  ;;  %v2339_v6 = vshrl.u32 %v3115_v17, 16  ;;  %v2342_v26 = vshll.u32 %v3115_v17, 16  ;;  %v2337_v28 = vrot.slane %v2333_v15, 4 }
 0x536   : > { %v2351_v22 = vsel %vm4081_vm5, %v2336_v18, %v2350_v20  ;;  %v2341_v24 = vrot.slane %v2339_v6, 7 }
 0x537   : > { %2352 = vst [vmem:[#allocation3] sm:$0xf] %v2351_v22 }
 0x538   : > { %v2344_v36 = vor.u32 %v2342_v26, %v2341_v24  ;;  %v2346_v29 = vrot.slane %v2341_v24, 4 }
 0x53a   : > { %v2345_v21 = vsel %vm3802_vm6, %v2337_v28, %v2344_v36  ;;  %v2355_v31 = vsel %vm4088_vm10, %v2346_v29, %v2354_v30 }
 0x53b   : > { %2353 = vst [vmem:[#allocation3 + $0x4] sm:$0xf] %v2345_v21  ;;  %2356 = vst [vmem:[#allocation3 + $0x8] sm:$0x1] %v2355_v31 }
 0x53e   : > { %v2357_v32 = vld [vmem:[#allocation3] sm:$0xf] }
 0x53f   : > { %v2592_v48 = vld [vmem:[#allocation3] sm:$0xe] }
 0x542   : > { %v2358_v33 = vld [vmem:[#allocation3 + $0x4] sm:$0xf]  ;;  %v3679_v54 = vld [vmem:[#allocation3 + $0x8] ss:$0 sps:$4 sm:$0x11]  }
 0x543   : > { %v3061_v35 = vcombine.low %v2357_v32, %v2358_v33  ;;  %v2408_v38 = vshll.u32 %v3679_v54, 16  ;;  %v3095_v49 = vcombine.low %v2592_v48, %v2358_v33  ;;  %v2613_v52 = vrot.slane %v3679_v54, 1 }
 0x545   : > { %3531 = vmatmul.mubr.bf16.vlgmr.msra.gmra.mxu0 %v3061_v35  ;;  %v2403_v37 = vshll.u32 %v3061_v35, 16  ;;  %v2401_v39 = vshrl.u32 %v3061_v35, 16  ;;  %v2410_v41 = vrot.slane %v2408_v38, 1  ;;  %v2612_v51 = vrot.slane %v3095_v49, 1 }
 0x547   : > { %v2405_v23 = vrot.slane %v2403_v37, 1  ;;  %v2614_v53 = vsel %vm990_vm14, %v2612_v51, %v2613_v52 }
 0x549   : > { %v2406_v40 = vor.u32 %v2405_v23, %v2401_v39 }
 0x54b   : > { %v2411_v61 = vsel %vm797_vm13, %v2406_v40, %v2410_v41 }
 0x54c   : > { %3511 = vmatmul.mubr.bf16.vlgmr.msra.gmra.mxu1 %v2411_v61 }
 0x54d   : > { %3535 = vmatpush3.bf16.msra.mxu1 %v3680_v19  ;;  %3550 = vmatprep.mubr.msk.bf16.mxu1 %vm3699_vm7, %v3698_v34 }
 0x54e   : > { %3536 = vmatprep.subr.bf16.mxu1 %v3698_v34 }
 0x551   : > { %3537 = vmatpush3.bf16.msra.mxu1 %v3681_v42 }
 0x552   : > { %3538 = vmatprep.subr.bf16.mxu1 %v3698_v34 }
 0x555   : > { %3539 = vmatpush3.bf16.msra.mxu1 %v3682_v43 }
 0x556   : > { %3540 = vmatprep.subr.bf16.mxu1 %v3698_v34 }
 0x559   : > { %3541 = vmatpush3.bf16.msra.mxu1 %v3683_v44 }
 0x55a   : > { %3542 = vmatprep.subr.bf16.mxu1 %v3698_v34 }
 0x55d   : > { %3543 = vmatpush3.bf16.msra.mxu1 %v3684_v45 }
 0x55e   : > { %3544 = vmatprep.subr.bf16.mxu1 %v3698_v34 }
 0x561   : > { %3545 = vmatpush3.bf16.msra.mxu1 %v3685_v46 }
 0x562   : > { %3546 = vmatprep.subr.bf16.mxu1 %v3698_v34 }
 0x565   : > { %3547 = vmatpush3.bf16.msra.mxu1 %v3686_v47 }
 0x566   : > { %3548 = vmatprep.subr.bf16.mxu1 %v3698_v34 }
 0x569   : > { %3549 = vmatpush3.bf16.msra.mxu1 %v3687_v50 }
 0x56c   : > { %3551 = vmatmul.mubr.bf16.vlgmr.msra.gmra.mxu1 %v2614_v53 }
 0x605   : > { %v2585_v55 = vpop.f32.mrf.mxu0 }
 0x607   : > { %v3532_v56 = vpop.f32.mrf.mxu0 }
 0x609   : > { %v2588_v57 = vpop.f32.mrf.mxu0 }
 0x60b   : > { %v3533_v58 = vpop.f32.mrf.mxu0 }
 0x60c   : > { %v2495_v59 = vpop.f32.mrf.mxu1 }
 0x60d   : > { %v2586_v0 = vadd.f32 %v2585_v55, %v2495_v59 }
 0x60e   : > { %v3512_v60 = vpop.f32.mrf.mxu1 }
 0x610   : > { %v2498_v62 = vpop.f32.mrf.mxu1 }
 0x611   : > { %v2589_v5 = vadd.f32 %v2588_v57, %v2498_v62 }
 0x612   : > { %v3513_v63 = vpop.f32.mrf.mxu1 }
 0x62c   : > { %v2698_v1 = vpop.f32.mrf.mxu1 }
 0x62d   : > { %v2705_v3 = vadd.f32 %v2698_v1, %v2586_v0 }
 0x62e   : > { %v3552_v34 = vpop.f32.mrf.mxu1 }
 0x62f   : > { %v2714_v7 = vadd.f32 %v4195_v2, %v2705_v3 }
 0x630   : > { %v2701_v8 = vpop.f32.mrf.mxu1 }
 0x631   : > { %vm2716_vm6 = vcmp.ge.f32.partialorder %v2714_v7, 0.0  ;;  %v2725_v25 = vmul.f32 %v4201_v4, %v2714_v7  ;;  %v2706_v9 = vadd.f32 %v2701_v8, %v2589_v5 }
 0x632   : > { %v3553_v27 = vpop.f32.mrf.mxu1 }
 0x633   : > { %v2727_v10 = vsel %vm2716_vm6, %v2714_v7, %v2725_v25  ;;  %v2715_v11 = vadd.f32 %v4195_v2, %v2706_v9 }
 0x634   : > { %3106 = vst [vmem:[%s4207_s26 + $0x10] sm:$0xff] %v2727_v10 }
 0x635   : > { %vm2717_vm7 = vcmp.ge.f32.partialorder %v2715_v11, 0.0  ;;  %v2726_v12 = vmul.f32 %v4201_v4, %v2715_v11 }
 0x637   : > { %v2728_v13 = vsel %vm2717_vm7, %v2715_v11, %v2726_v12 }
 0x638   : > { %3107 = vst [vmem:[%s4207_s26 + $0x18] sm:$0xff] %v2728_v13 }
 0x639 PF: > { %s21_s17 = sadd.s32 1, %s3695_s17  }
 0x63a   : > { %p18_p4 = scmp.ge.s32.totalorder %s21_s17, 4  }
 0x63c   :  { %20 = sbr.rel (!%p18_p4) target bundleno = 1 (0x1), region = 106 }

</bundles_post_ra>
